<compile_context>
chip_gen: v7x
topology: tpu7x:2x2x1
jax: 0.10.0
libtpu: 0.0.40
codegen_flags: <defaults>
</compile_context>

<pallas_src>
import functools

import jax
import jax.numpy as jnp
from jax.experimental import pallas as pl
from jax.experimental.pallas import tpu as pltpu


def _layernorm(x, g, b, eps=1e-5):
    mu = jnp.mean(x, axis=-1, keepdims=True)
    var = jnp.mean((x - mu) ** 2, axis=-1, keepdims=True)
    return (x - mu) * jax.lax.rsqrt(var + eps) * g + b


def transformer_layer_kernel(x_ref,
                             ln1_g_ref, ln1_b_ref, wqkv_ref, wo_ref, bo_ref,
                             ln2_g_ref, ln2_b_ref, w1_ref, b1_ref, w2_ref, b2_ref,
                             out_ref, *, heads, dim_head):
    bf16 = jnp.bfloat16
    Bb, N, D = x_ref.shape
    inner = heads * dim_head
    R = Bb * N                      # rows presented to the MXU per step
    G = Bb * heads                  # flattened (batch, head) axis for attention

    x = x_ref[...].reshape(R, D)    # (R, D) f32

    # ---------------- PreNorm + Attention + residual ----------------
    xn = _layernorm(x, ln1_g_ref[0, :], ln1_b_ref[0, :])                 # f32

    # Fused QKV projection: (R, D) x (D, 3*inner), f32 accumulation.
    # NOTE: the 1/sqrt(dim_head) scale is pre-folded into the q columns of wqkv.
    qkv = jnp.dot(xn.astype(bf16), wqkv_ref[...],
                  preferred_element_type=jnp.float32)                    # (R, 3*inner)
    qkv_b = qkv.astype(bf16)        # single cast; head relayouts done in bf16

    def split_heads(t):             # (R, inner) bf16 -> (G, N, dh) bf16
        return (t.reshape(Bb, N, heads, dim_head)
                 .transpose(0, 2, 1, 3)
                 .reshape(G, N, dim_head))

    q = split_heads(qkv_b[:, :inner])
    k = split_heads(qkv_b[:, inner:2 * inner])
    v = split_heads(qkv_b[:, 2 * inner:])

    dots = jnp.einsum('gnd,gmd->gnm', q, k,
                      preferred_element_type=jnp.float32)                # (G, N, N) f32
    dots = dots - jnp.max(dots, axis=-1, keepdims=True)                  # stable softmax
    p = jnp.exp(dots)
    inv = pl.reciprocal(jnp.sum(p, axis=-1, keepdims=True), approx=True)  # (G, N, 1)

    oh = jnp.einsum('gnm,gmd->gnd', p.astype(bf16), v,
                    preferred_element_type=jnp.float32)                  # (G, N, dh) f32
    oh = (oh * inv).astype(bf16)    # fold softmax denominator into the (N, dh) output
    o = (oh.reshape(Bb, heads, N, dim_head)
           .transpose(0, 2, 1, 3)
           .reshape(R, inner))                                           # (R, inner) bf16

    o_proj = jnp.dot(o, wo_ref[...],
                     preferred_element_type=jnp.float32) + bo_ref[0, :]  # (R, D)
    x = x + o_proj                                                        # residual

    # ---------------- PreNorm + FeedForward + residual ----------------
    xn2 = _layernorm(x, ln2_g_ref[0, :], ln2_b_ref[0, :])
    h1 = jnp.dot(xn2.astype(bf16), w1_ref[...],
                 preferred_element_type=jnp.float32) + b1_ref[0, :]       # (R, mlp)
    # exact GELU (PyTorch nn.GELU() default, erf-based), kept in f32
    h1 = 0.5 * h1 * (1.0 + jax.lax.erf(h1 * 0.7071067811865476))
    h2 = jnp.dot(h1.astype(bf16), w2_ref[...],
                 preferred_element_type=jnp.float32) + b2_ref[0, :]       # (R, D)

    out_ref[...] = (x + h2).reshape(Bb, N, D).astype(out_ref.dtype)


def _choose_block_b(B, N, target_rows=256, max_rows=4096):
    """Smallest divisor of B whose row count fills the MXU M dim (capped)."""
    divisors = [d for d in range(1, B + 1) if B % d == 0]
    best = divisors[-1]                       # default: whole batch per step
    for d in divisors:
        if d * N >= target_rows:
            best = d
            break
    if best * N > max_rows:
        fitting = [d for d in divisors if d * N <= max_rows]
        best = fitting[-1] if fitting else 1
    return best


def prepare_layer_params(p, *, heads, dim_head):
    """One-time host-side prep: (in,out) weight layout, bf16 cast, scale folding."""
    bf16 = jnp.bfloat16
    inner = heads * dim_head
    scale = dim_head ** -0.5
    wqkv_pt = p['wqkv']                                   # PyTorch layout (3*inner, D)
    wqkv_pt = jnp.concatenate([wqkv_pt[:inner] * scale,   # fold 1/sqrt(dh) into q rows
                               wqkv_pt[inner:]], axis=0)
    return dict(
        ln1_g=p['ln1_g'], ln1_b=p['ln1_b'],
        wqkv=jnp.transpose(wqkv_pt).astype(bf16),         # (D, 3*inner)
        wo=jnp.transpose(p['wo']).astype(bf16),           # (inner, D)
        bo=p['bo'],
        ln2_g=p['ln2_g'], ln2_b=p['ln2_b'],
        w1=jnp.transpose(p['w1']).astype(bf16),           # (D, mlp)
        b1=p['b1'],
        w2=jnp.transpose(p['w2']).astype(bf16),           # (mlp, D)
        b2=p['b2'],
    )


def transformer_layer(x, kp, *, heads, dim_head, block_b=None):
    B, N, D = x.shape
    inner = heads * dim_head
    mlp = kp['w1'].shape[1]
    if block_b is None:
        block_b = _choose_block_b(B, N)
    grid = (B // block_b,)

    kernel = functools.partial(transformer_layer_kernel,
                               heads=heads, dim_head=dim_head)

    def full(shape):
        return pl.BlockSpec(shape, lambda b: (0,) * len(shape))

    # Advisory cost estimate (per full call) so XLA can schedule around it.
    flops = int(2 * B * N * (D * 3 * inner          # qkv projection
                             + 2 * N * inner        # scores + attn@v
                             + inner * D            # output projection
                             + 2 * D * mlp))        # feed-forward
    transcendentals = int(B * (heads * N * N + N * mlp))       # exp + erf
    bytes_accessed = int(2 * B * N * D * 4                      # x in / out (f32)
                         + (3 * inner * D + inner * D + mlp * D + D * mlp) * 2  # bf16 W
                         + (4 * D + D + mlp + D) * 4)           # LN params + biases

    return pl.pallas_call(
        kernel,
        out_shape=jax.ShapeDtypeStruct((B, N, D), x.dtype),
        grid=grid,
        in_specs=[
            pl.BlockSpec((block_b, N, D), lambda b: (b, 0, 0)),   # x block
            full((1, D)), full((1, D)),                           # ln1 gamma/beta (f32)
            full((D, 3 * inner)),                                 # to_qkv weight (bf16, in-out)
            full((inner, D)), full((1, D)),                       # to_out weight (bf16) / bias (f32)
            full((1, D)), full((1, D)),                           # ln2 gamma/beta (f32)
            full((D, mlp)), full((1, mlp)),                       # ff linear1 weight (bf16) / bias (f32)
            full((mlp, D)), full((1, D)),                         # ff linear2 weight (bf16) / bias (f32)
        ],
        out_specs=pl.BlockSpec((block_b, N, D), lambda b: (b, 0, 0)),
        compiler_params=pltpu.CompilerParams(
            dimension_semantics=("parallel",),
            vmem_limit_bytes=64 * 1024 * 1024),
        cost_estimate=pl.CostEstimate(flops=flops,
                                      transcendentals=transcendentals,
                                      bytes_accessed=bytes_accessed),
    )(x, kp['ln1_g'], kp['ln1_b'], kp['wqkv'], kp['wo'], kp['bo'],
      kp['ln2_g'], kp['ln2_b'], kp['w1'], kp['b1'], kp['w2'], kp['b2'])


def transformer_forward(x, layer_params, *, heads, dim_head):
    # Parameter prep (transpose + bf16 cast + scale fold) happens ONCE, outside
    # the per-layer kernel calls.  In real use cache `prepared` across steps.
    prepared = [prepare_layer_params(p, heads=heads, dim_head=dim_head)
                for p in layer_params]
    for kp in prepared:
        x = transformer_layer(x, kp, heads=heads, dim_head=dim_head)
    return x


# ---------------- parameter init (deterministic, synthetic; PyTorch layout) ----
def init_layer_params(key, dim, heads, dim_head, mlp_dim):
    inner = heads * dim_head
    ks = jax.random.split(key, 6)
    s = 0.02
    f32 = jnp.float32
    return dict(
        ln1_g=jnp.ones((1, dim), f32),
        ln1_b=jnp.zeros((1, dim), f32),
        wqkv=(jax.random.normal(ks[0], (3 * inner, dim)) * s).astype(f32),
        wo=(jax.random.normal(ks[1], (dim, inner)) * s).astype(f32),
        bo=(jax.random.normal(ks[2], (1, dim)) * s).astype(f32),
        ln2_g=jnp.ones((1, dim), f32),
        ln2_b=jnp.zeros((1, dim), f32),
        w1=(jax.random.normal(ks[3], (mlp_dim, dim)) * s).astype(f32),
        b1=(jax.random.normal(ks[4], (1, mlp_dim)) * s).astype(f32),
        w2=(jax.random.normal(ks[5], (dim, mlp_dim)) * s).astype(f32),
        b2=jnp.zeros((1, dim), f32),
    )


# ---------------- pure-JAX reference (mirrors the PyTorch forward) ----------
def transformer_reference(x, layer_params, *, heads, dim_head):
    inner = heads * dim_head
    scale = dim_head ** -0.5

    def ln(v, g, b):
        mu = v.mean(-1, keepdims=True)
        var = ((v - mu) ** 2).mean(-1, keepdims=True)
        return (v - mu) / jnp.sqrt(var + 1e-5) * g + b

    B, N, _ = x.shape
    for p in layer_params:
        xn = ln(x, p['ln1_g'][0], p['ln1_b'][0])
        qkv = xn @ p['wqkv'].T
        q, k, v = jnp.split(qkv, 3, axis=-1)
        sh = lambda t: t.reshape(B, N, heads, dim_head).transpose(0, 2, 1, 3)
        q, k, v = sh(q), sh(k), sh(v)
        dots = jnp.einsum('bhnd,bhmd->bhnm', q, k) * scale
        attn = jax.nn.softmax(dots, axis=-1)
        o = jnp.einsum('bhnm,bhmd->bhnd', attn, v)
        o = o.transpose(0, 2, 1, 3).reshape(B, N, inner)
        x = x + o @ p['wo'].T + p['bo'][0]
        xn2 = ln(x, p['ln2_g'][0], p['ln2_b'][0])
        h = xn2 @ p['w1'].T + p['b1'][0]
        h = 0.5 * h * (1.0 + jax.lax.erf(h * 0.7071067811865476))
        x = x + h @ p['w2'].T + p['b2'][0]
    return x


if __name__ == "__main__":
    B, N = 2, 8
    dim, depth, heads, dim_head, mlp_dim = 32, 2, 4, 16, 64

    key = jax.random.PRNGKey(0)
    keys = jax.random.split(key, 1 + depth)
    x = jax.random.normal(keys[0], (B, N, dim), dtype=jnp.float32)
    layer_params = [init_layer_params(keys[1 + i], dim, heads, dim_head, mlp_dim)
                    for i in range(depth)]

    y = transformer_forward(x, layer_params, heads=heads, dim_head=dim_head)
    y = jax.block_until_ready(y)

    y_ref = transformer_reference(x, layer_params, heads=heads, dim_head=dim_head)
    assert y.shape == (B, N, dim)
    # bf16 matmul inputs (f32 accumulation) + approx reciprocal -> widened tolerance.
    assert jnp.allclose(y, y_ref, atol=2e-2, rtol=2e-2), "mismatch vs JAX reference"

    print("KERNEL_OK")
</pallas_src>

<mosaic_0001>
module attributes {stable_mosaic.version = 11 : i64} {
  func.func @transformer_layer_kernel(%arg0: i32, %arg1: memref<2x8x32xf32, #tpu.memory_space<vmem>>, %arg2: memref<1x32xf32, #tpu.memory_space<vmem>>, %arg3: memref<1x32xf32, #tpu.memory_space<vmem>>, %arg4: memref<32x192xbf16, #tpu.memory_space<vmem>>, %arg5: memref<64x32xbf16, #tpu.memory_space<vmem>>, %arg6: memref<1x32xf32, #tpu.memory_space<vmem>>, %arg7: memref<1x32xf32, #tpu.memory_space<vmem>>, %arg8: memref<1x32xf32, #tpu.memory_space<vmem>>, %arg9: memref<32x64xbf16, #tpu.memory_space<vmem>>, %arg10: memref<1x64xf32, #tpu.memory_space<vmem>>, %arg11: memref<64x32xbf16, #tpu.memory_space<vmem>>, %arg12: memref<1x32xf32, #tpu.memory_space<vmem>>, %arg13: memref<2x8x32xf32, #tpu.memory_space<vmem>>) attributes {dimension_semantics = [#tpu.dimension_semantics<parallel>], iteration_bounds = array<i64: 1>, scalar_prefetch = 0 : i64, scratch_operands = 0 : i64, tpu.core_type = #tpu.core_type<tc>, window_params = [{transform_indices = @transform_0, window_bounds = array<i64: 2, 8, 32>}, {pipeline_mode = #tpu.pipeline_mode<synchronous>, transform_indices = @transform_1, window_bounds = array<i64: 1, 32>}, {pipeline_mode = #tpu.pipeline_mode<synchronous>, transform_indices = @transform_2, window_bounds = array<i64: 1, 32>}, {pipeline_mode = #tpu.pipeline_mode<synchronous>, transform_indices = @transform_3, window_bounds = array<i64: 32, 192>}, {pipeline_mode = #tpu.pipeline_mode<synchronous>, transform_indices = @transform_4, window_bounds = array<i64: 64, 32>}, {pipeline_mode = #tpu.pipeline_mode<synchronous>, transform_indices = @transform_5, window_bounds = array<i64: 1, 32>}, {pipeline_mode = #tpu.pipeline_mode<synchronous>, transform_indices = @transform_6, window_bounds = array<i64: 1, 32>}, {pipeline_mode = #tpu.pipeline_mode<synchronous>, transform_indices = @transform_7, window_bounds = array<i64: 1, 32>}, {pipeline_mode = #tpu.pipeline_mode<synchronous>, transform_indices = @transform_8, window_bounds = array<i64: 32, 64>}, {pipeline_mode = #tpu.pipeline_mode<synchronous>, transform_indices = @transform_9, window_bounds = array<i64: 1, 64>}, {pipeline_mode = #tpu.pipeline_mode<synchronous>, transform_indices = @transform_10, window_bounds = array<i64: 64, 32>}, {pipeline_mode = #tpu.pipeline_mode<synchronous>, transform_indices = @transform_11, window_bounds = array<i64: 1, 32>}, {transform_indices = @transform_12, window_bounds = array<i64: 2, 8, 32>}]} {
    %c0 = arith.constant 0 : index
    %c0_0 = arith.constant 0 : index
    %c0_1 = arith.constant 0 : index
    %0 = vector.load %arg1[%c0, %c0_0, %c0_1] : memref<2x8x32xf32, #tpu.memory_space<vmem>>, vector<2x8x32xf32>
    %1 = vector.shape_cast %0 : vector<2x8x32xf32> to vector<16x32xf32>
    %c0_2 = arith.constant 0 : index
    %c0_3 = arith.constant 0 : index
    %2 = vector.load %arg2[%c0_2, %c0_3] : memref<1x32xf32, #tpu.memory_space<vmem>>, vector<1x32xf32>
    %3 = vector.shape_cast %2 : vector<1x32xf32> to vector<32xf32>
    %c0_4 = arith.constant 0 : index
    %c0_5 = arith.constant 0 : index
    %4 = vector.load %arg3[%c0_4, %c0_5] : memref<1x32xf32, #tpu.memory_space<vmem>>, vector<1x32xf32>
    %5 = vector.shape_cast %4 : vector<1x32xf32> to vector<32xf32>
    %cst = arith.constant dense<0.000000e+00> : vector<16xf32>
    %6 = vector.multi_reduction <add>, %1, %cst [1] : vector<16x32xf32> to vector<16xf32>
    %7 = vector.shape_cast %6 : vector<16xf32> to vector<16x1xf32>
    %cst_6 = arith.constant 3.200000e+01 : f32
    %8 = vector.broadcast %cst_6 : f32 to vector<16x1xf32>
    %9 = arith.divf %7, %8 : vector<16x1xf32>
    %10 = vector.broadcast %9 : vector<16x1xf32> to vector<16x32xf32>
    %11 = arith.subf %1, %10 : vector<16x32xf32>
    %12 = arith.mulf %11, %11 : vector<16x32xf32>
    %cst_7 = arith.constant dense<0.000000e+00> : vector<16xf32>
    %13 = vector.multi_reduction <add>, %12, %cst_7 [1] : vector<16x32xf32> to vector<16xf32>
    %14 = vector.shape_cast %13 : vector<16xf32> to vector<16x1xf32>
    %cst_8 = arith.constant 3.200000e+01 : f32
    %15 = vector.broadcast %cst_8 : f32 to vector<16x1xf32>
    %16 = arith.divf %14, %15 : vector<16x1xf32>
    %17 = vector.broadcast %9 : vector<16x1xf32> to vector<16x32xf32>
    %18 = arith.subf %1, %17 : vector<16x32xf32>
    %cst_9 = arith.constant 9.99999974E-6 : f32
    %19 = vector.broadcast %cst_9 : f32 to vector<16x1xf32>
    %20 = arith.addf %16, %19 : vector<16x1xf32>
    %21 = math.rsqrt %20 : vector<16x1xf32>
    %22 = vector.broadcast %21 : vector<16x1xf32> to vector<16x32xf32>
    %23 = arith.mulf %18, %22 : vector<16x32xf32>
    %24 = vector.shape_cast %3 : vector<32xf32> to vector<1x32xf32>
    %25 = vector.broadcast %24 : vector<1x32xf32> to vector<16x32xf32>
    %26 = arith.mulf %23, %25 : vector<16x32xf32>
    %27 = vector.shape_cast %5 : vector<32xf32> to vector<1x32xf32>
    %28 = vector.broadcast %27 : vector<1x32xf32> to vector<16x32xf32>
    %29 = arith.addf %26, %28 : vector<16x32xf32>
    %30 = arith.truncf %29 : vector<16x32xf32> to vector<16x32xbf16>
    %c0_10 = arith.constant 0 : index
    %c0_11 = arith.constant 0 : index
    %31 = vector.load %arg4[%c0_10, %c0_11] : memref<32x192xbf16, #tpu.memory_space<vmem>>, vector<32x192xbf16>
    %cst_12 = arith.constant dense<0.000000e+00> : vector<16x192xf32>
    %32 = tpu.matmul %30, %31, %cst_12 {dimension_numbers = #tpu.dot_dimension_numbers<[1], [0], [0], [1], [0, 0, 1, 1], [], []>} : vector<16x32xbf16>, vector<32x192xbf16>, vector<16x192xf32> -> vector<16x192xf32>
    %33 = arith.truncf %32 : vector<16x192xf32> to vector<16x192xbf16>
    %34 = vector.extract_strided_slice %33 {offsets = [0, 0], sizes = [16, 64], strides = [1, 1]} : vector<16x192xbf16> to vector<16x64xbf16>
    %35 = vector.shape_cast %34 : vector<16x64xbf16> to vector<2x8x4x16xbf16>
    %36 = tpu.transpose %35, [0, 2, 1, 3] : vector<2x8x4x16xbf16> -> vector<2x4x8x16xbf16>
    %37 = vector.shape_cast %36 : vector<2x4x8x16xbf16> to vector<8x8x16xbf16>
    %38 = vector.extract_strided_slice %33 {offsets = [0, 64], sizes = [16, 64], strides = [1, 1]} : vector<16x192xbf16> to vector<16x64xbf16>
    %39 = vector.shape_cast %38 : vector<16x64xbf16> to vector<2x8x4x16xbf16>
    %40 = tpu.transpose %39, [0, 2, 1, 3] : vector<2x8x4x16xbf16> -> vector<2x4x8x16xbf16>
    %41 = vector.shape_cast %40 : vector<2x4x8x16xbf16> to vector<8x8x16xbf16>
    %42 = vector.extract_strided_slice %33 {offsets = [0, 128], sizes = [16, 64], strides = [1, 1]} : vector<16x192xbf16> to vector<16x64xbf16>
    %43 = vector.shape_cast %42 : vector<16x64xbf16> to vector<2x8x4x16xbf16>
    %44 = tpu.transpose %43, [0, 2, 1, 3] : vector<2x8x4x16xbf16> -> vector<2x4x8x16xbf16>
    %45 = vector.shape_cast %44 : vector<2x4x8x16xbf16> to vector<8x8x16xbf16>
    "tpu.trace_start"() <{level = 10 : i32, message = "gnd,gmd->gnm"}> : () -> ()
    %cst_13 = arith.constant dense<0.000000e+00> : vector<8x8x8xf32>
    %46 = tpu.matmul %37, %41, %cst_13 {dimension_numbers = #tpu.dot_dimension_numbers<[2], [2], [1], [1], [0, 0, 0, 1, 1, 1], [0], [0]>} : vector<8x8x16xbf16>, vector<8x8x16xbf16>, vector<8x8x8xf32> -> vector<8x8x8xf32>
    "tpu.trace_stop"() : () -> ()
    %cst_14 = arith.constant dense<0xFF800000> : vector<8x8xf32>
    %47 = vector.multi_reduction <maximumf>, %46, %cst_14 [2] : vector<8x8x8xf32> to vector<8x8xf32>
    %48 = vector.shape_cast %47 : vector<8x8xf32> to vector<8x8x1xf32>
    %49 = vector.broadcast %48 : vector<8x8x1xf32> to vector<8x8x8xf32>
    %50 = arith.subf %46, %49 : vector<8x8x8xf32>
    %51 = math.exp %50 : vector<8x8x8xf32>
    %cst_15 = arith.constant dense<0.000000e+00> : vector<8x8xf32>
    %52 = vector.multi_reduction <add>, %51, %cst_15 [2] : vector<8x8x8xf32> to vector<8x8xf32>
    %53 = vector.shape_cast %52 : vector<8x8xf32> to vector<8x8x1xf32>
    %54 = tpu.reciprocal %53 {approx = true} : vector<8x8x1xf32> -> vector<8x8x1xf32>
    %55 = arith.truncf %51 : vector<8x8x8xf32> to vector<8x8x8xbf16>
    "tpu.trace_start"() <{level = 10 : i32, message = "gnm,gmd->gnd"}> : () -> ()
    %cst_16 = arith.constant dense<0.000000e+00> : vector<8x8x16xf32>
    %56 = tpu.matmul %55, %45, %cst_16 {dimension_numbers = #tpu.dot_dimension_numbers<[2], [1], [1], [2], [0, 0, 0, 1, 1, 2], [0], [0]>} : vector<8x8x8xbf16>, vector<8x8x16xbf16>, vector<8x8x16xf32> -> vector<8x8x16xf32>
    "tpu.trace_stop"() : () -> ()
    %57 = vector.broadcast %54 : vector<8x8x1xf32> to vector<8x8x16xf32>
    %58 = arith.mulf %56, %57 : vector<8x8x16xf32>
    %59 = arith.truncf %58 : vector<8x8x16xf32> to vector<8x8x16xbf16>
    %60 = vector.shape_cast %59 : vector<8x8x16xbf16> to vector<2x4x8x16xbf16>
    %61 = tpu.transpose %60, [0, 2, 1, 3] : vector<2x4x8x16xbf16> -> vector<2x8x4x16xbf16>
    %62 = vector.shape_cast %61 : vector<2x8x4x16xbf16> to vector<16x64xbf16>
    %c0_17 = arith.constant 0 : index
    %c0_18 = arith.constant 0 : index
    %63 = vector.load %arg5[%c0_17, %c0_18] : memref<64x32xbf16, #tpu.memory_space<vmem>>, vector<64x32xbf16>
    %cst_19 = arith.constant dense<0.000000e+00> : vector<16x32xf32>
    %64 = tpu.matmul %62, %63, %cst_19 {dimension_numbers = #tpu.dot_dimension_numbers<[1], [0], [0], [1], [0, 0, 1, 1], [], []>} : vector<16x64xbf16>, vector<64x32xbf16>, vector<16x32xf32> -> vector<16x32xf32>
    %c0_20 = arith.constant 0 : index
    %c0_21 = arith.constant 0 : index
    %65 = vector.load %arg6[%c0_20, %c0_21] : memref<1x32xf32, #tpu.memory_space<vmem>>, vector<1x32xf32>
    %66 = vector.shape_cast %65 : vector<1x32xf32> to vector<32xf32>
    %67 = vector.shape_cast %66 : vector<32xf32> to vector<1x32xf32>
    %68 = vector.broadcast %67 : vector<1x32xf32> to vector<16x32xf32>
    %69 = arith.addf %64, %68 : vector<16x32xf32>
    %70 = arith.addf %1, %69 : vector<16x32xf32>
    %c0_22 = arith.constant 0 : index
    %c0_23 = arith.constant 0 : index
    %71 = vector.load %arg7[%c0_22, %c0_23] : memref<1x32xf32, #tpu.memory_space<vmem>>, vector<1x32xf32>
    %72 = vector.shape_cast %71 : vector<1x32xf32> to vector<32xf32>
    %c0_24 = arith.constant 0 : index
    %c0_25 = arith.constant 0 : index
    %73 = vector.load %arg8[%c0_24, %c0_25] : memref<1x32xf32, #tpu.memory_space<vmem>>, vector<1x32xf32>
    %74 = vector.shape_cast %73 : vector<1x32xf32> to vector<32xf32>
    %cst_26 = arith.constant dense<0.000000e+00> : vector<16xf32>
    %75 = vector.multi_reduction <add>, %70, %cst_26 [1] : vector<16x32xf32> to vector<16xf32>
    %76 = vector.shape_cast %75 : vector<16xf32> to vector<16x1xf32>
    %cst_27 = arith.constant 3.200000e+01 : f32
    %77 = vector.broadcast %cst_27 : f32 to vector<16x1xf32>
    %78 = arith.divf %76, %77 : vector<16x1xf32>
    %79 = vector.broadcast %78 : vector<16x1xf32> to vector<16x32xf32>
    %80 = arith.subf %70, %79 : vector<16x32xf32>
    %81 = arith.mulf %80, %80 : vector<16x32xf32>
    %cst_28 = arith.constant dense<0.000000e+00> : vector<16xf32>
    %82 = vector.multi_reduction <add>, %81, %cst_28 [1] : vector<16x32xf32> to vector<16xf32>
    %83 = vector.shape_cast %82 : vector<16xf32> to vector<16x1xf32>
    %cst_29 = arith.constant 3.200000e+01 : f32
    %84 = vector.broadcast %cst_29 : f32 to vector<16x1xf32>
    %85 = arith.divf %83, %84 : vector<16x1xf32>
    %86 = vector.broadcast %78 : vector<16x1xf32> to vector<16x32xf32>
    %87 = arith.subf %70, %86 : vector<16x32xf32>
    %cst_30 = arith.constant 9.99999974E-6 : f32
    %88 = vector.broadcast %cst_30 : f32 to vector<16x1xf32>
    %89 = arith.addf %85, %88 : vector<16x1xf32>
    %90 = math.rsqrt %89 : vector<16x1xf32>
    %91 = vector.broadcast %90 : vector<16x1xf32> to vector<16x32xf32>
    %92 = arith.mulf %87, %91 : vector<16x32xf32>
    %93 = vector.shape_cast %72 : vector<32xf32> to vector<1x32xf32>
    %94 = vector.broadcast %93 : vector<1x32xf32> to vector<16x32xf32>
    %95 = arith.mulf %92, %94 : vector<16x32xf32>
    %96 = vector.shape_cast %74 : vector<32xf32> to vector<1x32xf32>
    %97 = vector.broadcast %96 : vector<1x32xf32> to vector<16x32xf32>
    %98 = arith.addf %95, %97 : vector<16x32xf32>
    %99 = arith.truncf %98 : vector<16x32xf32> to vector<16x32xbf16>
    %c0_31 = arith.constant 0 : index
    %c0_32 = arith.constant 0 : index
    %100 = vector.load %arg9[%c0_31, %c0_32] : memref<32x64xbf16, #tpu.memory_space<vmem>>, vector<32x64xbf16>
    %cst_33 = arith.constant dense<0.000000e+00> : vector<16x64xf32>
    %101 = tpu.matmul %99, %100, %cst_33 {dimension_numbers = #tpu.dot_dimension_numbers<[1], [0], [0], [1], [0, 0, 1, 1], [], []>} : vector<16x32xbf16>, vector<32x64xbf16>, vector<16x64xf32> -> vector<16x64xf32>
    %c0_34 = arith.constant 0 : index
    %c0_35 = arith.constant 0 : index
    %102 = vector.load %arg10[%c0_34, %c0_35] : memref<1x64xf32, #tpu.memory_space<vmem>>, vector<1x64xf32>
    %103 = vector.shape_cast %102 : vector<1x64xf32> to vector<64xf32>
    %104 = vector.shape_cast %103 : vector<64xf32> to vector<1x64xf32>
    %105 = vector.broadcast %104 : vector<1x64xf32> to vector<16x64xf32>
    %106 = arith.addf %101, %105 : vector<16x64xf32>
    %cst_36 = arith.constant 5.000000e-01 : f32
    %107 = vector.broadcast %cst_36 : f32 to vector<16x64xf32>
    %108 = arith.mulf %107, %106 : vector<16x64xf32>
    %cst_37 = arith.constant 0.707106769 : f32
    %109 = vector.broadcast %cst_37 : f32 to vector<16x64xf32>
    %110 = arith.mulf %106, %109 : vector<16x64xf32>
    %111 = math.erf %110 : vector<16x64xf32>
    %cst_38 = arith.constant 1.000000e+00 : f32
    %112 = vector.broadcast %cst_38 : f32 to vector<16x64xf32>
    %113 = arith.addf %112, %111 : vector<16x64xf32>
    %114 = arith.mulf %108, %113 : vector<16x64xf32>
    %115 = arith.truncf %114 : vector<16x64xf32> to vector<16x64xbf16>
    %c0_39 = arith.constant 0 : index
    %c0_40 = arith.constant 0 : index
    %116 = vector.load %arg11[%c0_39, %c0_40] : memref<64x32xbf16, #tpu.memory_space<vmem>>, vector<64x32xbf16>
    %cst_41 = arith.constant dense<0.000000e+00> : vector<16x32xf32>
    %117 = tpu.matmul %115, %116, %cst_41 {dimension_numbers = #tpu.dot_dimension_numbers<[1], [0], [0], [1], [0, 0, 1, 1], [], []>} : vector<16x64xbf16>, vector<64x32xbf16>, vector<16x32xf32> -> vector<16x32xf32>
    %c0_42 = arith.constant 0 : index
    %c0_43 = arith.constant 0 : index
    %118 = vector.load %arg12[%c0_42, %c0_43] : memref<1x32xf32, #tpu.memory_space<vmem>>, vector<1x32xf32>
    %119 = vector.shape_cast %118 : vector<1x32xf32> to vector<32xf32>
    %120 = vector.shape_cast %119 : vector<32xf32> to vector<1x32xf32>
    %121 = vector.broadcast %120 : vector<1x32xf32> to vector<16x32xf32>
    %122 = arith.addf %117, %121 : vector<16x32xf32>
    %123 = arith.addf %70, %122 : vector<16x32xf32>
    %124 = vector.shape_cast %123 : vector<16x32xf32> to vector<2x8x32xf32>
    %c0_44 = arith.constant 0 : index
    %c0_45 = arith.constant 0 : index
    %c0_46 = arith.constant 0 : index
    %125 = vector.load %arg13[%c0_44, %c0_45, %c0_46] : memref<2x8x32xf32, #tpu.memory_space<vmem>>, vector<2x8x32xf32>
    tpu.vector_store %arg13[%c0_44, %c0_45, %c0_46], %124 {strides = array<i32>} : memref<2x8x32xf32, #tpu.memory_space<vmem>>, vector<2x8x32xf32>,
    return
  }
  func.func @transform_0(%arg0: i32) -> (i32, i32, i32) {
    %c0_i32 = arith.constant 0 : i32
    %c0_i32_0 = arith.constant 0 : i32
    %c0_i32_1 = arith.constant 0 : i32
    return %arg0, %c0_i32, %c0_i32_0 : i32, i32, i32
  }
  func.func @transform_1(%arg0: i32) -> (i32, i32) {
    %c0_i32 = arith.constant 0 : i32
    %c0_i32_0 = arith.constant 0 : i32
    %c0_i32_1 = arith.constant 0 : i32
    return %c0_i32, %c0_i32_0 : i32, i32
  }
  func.func @transform_2(%arg0: i32) -> (i32, i32) {
    %c0_i32 = arith.constant 0 : i32
    %c0_i32_0 = arith.constant 0 : i32
    %c0_i32_1 = arith.constant 0 : i32
    return %c0_i32, %c0_i32_0 : i32, i32
  }
  func.func @transform_3(%arg0: i32) -> (i32, i32) {
    %c0_i32 = arith.constant 0 : i32
    %c0_i32_0 = arith.constant 0 : i32
    %c0_i32_1 = arith.constant 0 : i32
    return %c0_i32, %c0_i32_0 : i32, i32
  }
  func.func @transform_4(%arg0: i32) -> (i32, i32) {
    %c0_i32 = arith.constant 0 : i32
    %c0_i32_0 = arith.constant 0 : i32
    %c0_i32_1 = arith.constant 0 : i32
    return %c0_i32, %c0_i32_0 : i32, i32
  }
  func.func @transform_5(%arg0: i32) -> (i32, i32) {
    %c0_i32 = arith.constant 0 : i32
    %c0_i32_0 = arith.constant 0 : i32
    %c0_i32_1 = arith.constant 0 : i32
    return %c0_i32, %c0_i32_0 : i32, i32
  }
  func.func @transform_6(%arg0: i32) -> (i32, i32) {
    %c0_i32 = arith.constant 0 : i32
    %c0_i32_0 = arith.constant 0 : i32
    %c0_i32_1 = arith.constant 0 : i32
    return %c0_i32, %c0_i32_0 : i32, i32
  }
  func.func @transform_7(%arg0: i32) -> (i32, i32) {
    %c0_i32 = arith.constant 0 : i32
    %c0_i32_0 = arith.constant 0 : i32
    %c0_i32_1 = arith.constant 0 : i32
    return %c0_i32, %c0_i32_0 : i32, i32
  }
  func.func @transform_8(%arg0: i32) -> (i32, i32) {
    %c0_i32 = arith.constant 0 : i32
    %c0_i32_0 = arith.constant 0 : i32
    %c0_i32_1 = arith.constant 0 : i32
    return %c0_i32, %c0_i32_0 : i32, i32
  }
  func.func @transform_9(%arg0: i32) -> (i32, i32) {
    %c0_i32 = arith.constant 0 : i32
    %c0_i32_0 = arith.constant 0 : i32
    %c0_i32_1 = arith.constant 0 : i32
    return %c0_i32, %c0_i32_0 : i32, i32
  }
  func.func @transform_10(%arg0: i32) -> (i32, i32) {
    %c0_i32 = arith.constant 0 : i32
    %c0_i32_0 = arith.constant 0 : i32
    %c0_i32_1 = arith.constant 0 : i32
    return %c0_i32, %c0_i32_0 : i32, i32
  }
  func.func @transform_11(%arg0: i32) -> (i32, i32) {
    %c0_i32 = arith.constant 0 : i32
    %c0_i32_0 = arith.constant 0 : i32
    %c0_i32_1 = arith.constant 0 : i32
    return %c0_i32, %c0_i32_0 : i32, i32
  }
  func.func @transform_12(%arg0: i32) -> (i32, i32, i32) {
    %c0_i32 = arith.constant 0 : i32
    %c0_i32_0 = arith.constant 0 : i32
    %c0_i32_1 = arith.constant 0 : i32
    return %arg0, %c0_i32, %c0_i32_0 : i32, i32, i32
  }
}

</mosaic_0001>

<bundles_post_ra>
// kernel: tpu_custom_call.1
= control target key start
LH: loop header
LB: loop body
LE: loop exit
PB: predicated region body
PF: predicated region fallthrough
CT: control target
= control target key end

     0   :  { %17 = vsyncpa [#allocation3], 0  ;;  %s3936_s0 = inlined_call_operand.hbm [shape: f32[2,8,32], index: 0, kind: input, shape index: {}]   ;;  %s3937_s1 = inlined_call_operand.hbm [shape: f32[1,32], index: 1, kind: input, shape index: {}]   ;;  %s3938_s2 = inlined_call_operand.hbm [shape: f32[1,32], index: 2, kind: input, shape index: {}]   ;;  %s3939_s3 = inlined_call_operand.hbm [shape: bf16[32,192], index: 3, kind: input, shape index: {}]   ;;  %s3940_s4 = inlined_call_operand.hbm [shape: bf16[64,32], index: 4, kind: input, shape index: {}]   ;;  %s3941_s5 = inlined_call_operand.hbm [shape: f32[1,32], index: 5, kind: input, shape index: {}]   ;;  %s3942_s6 = inlined_call_operand.hbm [shape: f32[1,32], index: 6, kind: input, shape index: {}]   ;;  %s3943_s7 = inlined_call_operand.hbm [shape: f32[1,32], index: 7, kind: input, shape index: {}]   ;;  %s3944_s8 = inlined_call_operand.hbm [shape: bf16[32,64], index: 8, kind: input, shape index: {}]   ;;  %s3945_s9 = inlined_call_operand.hbm [shape: f32[1,64], index: 9, kind: input, shape index: {}]   ;;  %s3946_s10 = inlined_call_operand.hbm [shape: bf16[64,32], index: 10, kind: input, shape index: {}]   ;;  %s3947_s11 = inlined_call_operand.hbm [shape: f32[1,32], index: 11, kind: input, shape index: {}]   ;;  %s3948_s12 = inlined_call_operand.hbm [shape: f32[2,8,32], index: 12, kind: output, shape index: {}]  }
   0x1   :  { %18 = vsyncpa [#allocation6], 0 }
   0x2   :  { %19 = vsyncpa [#allocation9], 0 }
   0x3   :  { %20 = vsyncpa [#allocation12], 0 }
   0x4   :  { %21 = vsyncpa [#allocation15], 0 }
   0x5   :  { %22 = vsyncpa [#allocation18], 0 }
   0x6   :  { %23 = vsyncpa [#allocation21], 0 }
   0x7   :  { %24 = vsyncpa [#allocation4], 0  ;;  %s3254_s21 = smov [#allocation5]   ;;  %s2952_s25 = scalar_lea.hbm %s3937_s1, 16 }
   0x8   :  { %s43_s22 = sshll.u32 %s3254_s21, 4  ;;  %p2953_p0 = scmp.ne.s32.totalorder %s3937_s1, %s2952_s25  ;;  %s44_s22 = int_to_ptr.vmem [resolvable:$true] %s43_s22 }
   0x9   :  { %p2956_p1 = scmp.lt.u32.totalorder %s2952_s25, %s3937_s1 }
   0xb   :  { %p2958_p2 = pnand %p2956_p1, %p2953_p0 }
   0xd   :  { %2961 = shalt.err (!%p2958_p2)
}
   0xe   :  { %s2962_s30 = scalar_lea.vmem %s44_s22, 16  ;;  %s2966_s13 = scalar_lea.vmem %s44_s22, 32 }
   0xf   :  { %p2963_p3 = scmp.ne.s32.totalorder %s44_s22, %s2962_s30  ;;  %p2967_p4 = scmp.lt.s32.totalorder %s44_s22, %s44_s22 }
  0x10   :  { %p2968_p5 = scmp.lt.s32.totalorder %s2966_s13, %s2962_s30 }
  0x12   :  { %p2969_p6 = por %p2968_p5, %p2967_p4 }
  0x14   :  { %p2970_p7 = pnand %p2969_p6, %p2963_p3 }
  0x16   :  { %2973 = shalt.err (!%p2970_p7)
}
  0x17   :  { %46 = dma.hbm_to_vmem [thread:$0]  %s3937_s1, 16, %s44_s22, [#allocation6]  }
  0x18   :  { %s3255_s16 = smov [#allocation8]   ;;  %s3256_s18 = smov [#allocation11]  }
  0x19   :  { %s62_s17 = sshll.u32 %s3255_s16, 4  ;;  %s87_s19 = sshll.u32 %s3256_s18, 4  ;;  %s63_s17 = int_to_ptr.vmem [resolvable:$true] %s62_s17  ;;  %s88_s19 = int_to_ptr.vmem [resolvable:$true] %s87_s19 }
  0x1a   :  { %s2974_s23 = scalar_lea.hbm %s3939_s3, 512 }
  0x1b   :  { %p2975_p8 = scmp.ne.s32.totalorder %s3939_s3, %s2974_s23  ;;  %p2978_p9 = scmp.lt.u32.totalorder %s2974_s23, %s3939_s3 }
  0x1d   :  { %p2980_p10 = pnand %p2978_p9, %p2975_p8 }
  0x1f   :  { %2983 = shalt.err (!%p2980_p10)
}
  0x20   :  { %s2984_s1 = scalar_lea.vmem %s63_s17, 512  ;;  %p2989_p12 = scmp.lt.s32.totalorder %s63_s17, %s63_s17 }
  0x21   :  { %p2985_p11 = scmp.ne.s32.totalorder %s63_s17, %s2984_s1  ;;  %p2990_p13 = scmp.lt.s32.totalorder %s2984_s1, %s2984_s1 }
  0x23   :  { %p2991_p0 = por %p2990_p13, %p2989_p12 }
  0x25   :  { %p2992_p1 = pnand %p2991_p0, %p2985_p11 }
  0x27   :  { %2995 = shalt.err (!%p2992_p1)
}
  0x28   :  { %s3257_s22 = smov 128   ;;  %s3258_s28 = smov 8  }
  0x29   :  { %68 = dma.hbm_to_vmem [thread:$0]  %s3939_s3, 512, %s63_s17, [#allocation9], %s3257_s22, %s3257_s22, %s3258_s28  }
  0x2a   :  { %s2996_s15 = scalar_lea.hbm %s3941_s5, 16 }
  0x2b   :  { %p2997_p2 = scmp.ne.s32.totalorder %s3941_s5, %s2996_s15  ;;  %p3000_p3 = scmp.lt.u32.totalorder %s2996_s15, %s3941_s5 }
  0x2d   :  { %p3002_p4 = pnand %p3000_p3, %p2997_p2 }
  0x2f   :  { %3005 = shalt.err (!%p3002_p4)
}
  0x30   :  { %s3006_s23 = scalar_lea.vmem %s88_s19, 16  ;;  %s3010_s24 = scalar_lea.vmem %s88_s19, 32 }
  0x31   :  { %p3007_p5 = scmp.ne.s32.totalorder %s88_s19, %s3006_s23  ;;  %p3011_p6 = scmp.lt.s32.totalorder %s88_s19, %s88_s19 }
  0x32   :  { %p3012_p7 = scmp.lt.s32.totalorder %s3010_s24, %s3006_s23 }
  0x34   :  { %p3013_p8 = por %p3012_p7, %p3011_p6 }
  0x36   :  { %p3014_p9 = pnand %p3013_p8, %p3007_p5 }
  0x38   :  { %3017 = shalt.err (!%p3014_p9)
}
  0x39   :  { %90 = dma.hbm_to_vmem [thread:$0]  %s3941_s5, 16, %s88_s19, [#allocation12]  }
  0x3a   :  { %s3259_s25 = smov [#allocation14]   ;;  %s3260_s27 = smov [#allocation17]  }
  0x3b   :  { %s107_s26 = sshll.u32 %s3259_s25, 4  ;;  %s129_s1 = sshll.u32 %s3260_s27, 4  ;;  %s108_s26 = int_to_ptr.vmem [resolvable:$true] %s107_s26  ;;  %s130_s1 = int_to_ptr.vmem [resolvable:$true] %s129_s1 }
  0x3c   :  { %s3018_s13 = scalar_lea.hbm %s3943_s7, 16 }
  0x3d   :  { %p3019_p10 = scmp.ne.s32.totalorder %s3943_s7, %s3018_s13  ;;  %p3022_p11 = scmp.lt.u32.totalorder %s3018_s13, %s3943_s7 }
  0x3f   :  { %p3024_p12 = pnand %p3022_p11, %p3019_p10 }
  0x41   :  { %3027 = shalt.err (!%p3024_p12)
}
  0x42   :  { %s3028_s5 = scalar_lea.vmem %s108_s26, 16  ;;  %s3032_s19 = scalar_lea.vmem %s108_s26, 32 }
  0x43   :  { %p3029_p13 = scmp.ne.s32.totalorder %s108_s26, %s3028_s5  ;;  %p3033_p0 = scmp.lt.s32.totalorder %s108_s26, %s108_s26 }
  0x44   :  { %p3034_p1 = scmp.lt.s32.totalorder %s3032_s19, %s3028_s5 }
  0x46   :  { %p3035_p2 = por %p3034_p1, %p3033_p0 }
  0x48   :  { %p3036_p3 = pnand %p3035_p2, %p3029_p13 }
  0x4a   :  { %3039 = shalt.err (!%p3036_p3)
}
  0x4b   :  { %110 = dma.hbm_to_vmem [thread:$0]  %s3943_s7, 16, %s108_s26, [#allocation15]  }
  0x4c   :  { %s3040_s3 = scalar_lea.hbm %s3945_s9, 16 }
  0x4d   :  { %p3041_p4 = scmp.ne.s32.totalorder %s3945_s9, %s3040_s3  ;;  %p3044_p5 = scmp.lt.u32.totalorder %s3040_s3, %s3945_s9 }
  0x4f   :  { %p3046_p6 = pnand %p3044_p5, %p3041_p4 }
  0x51   :  { %3049 = shalt.err (!%p3046_p6)
}
  0x52   :  { %s3050_s30 = scalar_lea.vmem %s130_s1, 16  ;;  %s3054_s13 = scalar_lea.vmem %s130_s1, 32 }
  0x53   :  { %p3051_p7 = scmp.ne.s32.totalorder %s130_s1, %s3050_s30  ;;  %p3055_p8 = scmp.lt.s32.totalorder %s130_s1, %s130_s1 }
  0x54   :  { %p3056_p9 = scmp.lt.s32.totalorder %s3054_s13, %s3050_s30 }
  0x56   :  { %p3057_p10 = por %p3056_p9, %p3055_p8 }
  0x58   :  { %p3058_p11 = pnand %p3057_p10, %p3051_p7 }
  0x5a   :  { %3061 = shalt.err (!%p3058_p11)
}
  0x5b   :  { %132 = dma.hbm_to_vmem [thread:$0]  %s3945_s9, 16, %s130_s1, [#allocation18]  }
  0x5c   :  { %s3261_s14 = smov [#allocation2]   ;;  %s3262_s16 = smov [#allocation7]  }
  0x5d   :  { %s30_s15 = sshll.u32 %s3261_s14, 4  ;;  %s53_s18 = sshll.u32 %s3262_s16, 4  ;;  %s31_s15 = int_to_ptr.vmem [resolvable:$true] %s30_s15  ;;  %s54_s18 = int_to_ptr.vmem [resolvable:$true] %s53_s18 }
  0x5e   :  { %s3062_s20 = scalar_lea.hbm %s3936_s0, 256 }
  0x5f   :  { %p3063_p12 = scmp.ne.s32.totalorder %s3936_s0, %s3062_s20  ;;  %p3066_p13 = scmp.lt.u32.totalorder %s3062_s20, %s3936_s0 }
  0x61   :  { %p3068_p0 = pnand %p3066_p13, %p3063_p12 }
  0x63   :  { %3071 = shalt.err (!%p3068_p0)
}
  0x64   :  { %s3072_s9 = scalar_lea.vmem %s31_s15, 256  ;;  %p3077_p2 = scmp.lt.s32.totalorder %s31_s15, %s31_s15 }
  0x65   :  { %p3073_p1 = scmp.ne.s32.totalorder %s31_s15, %s3072_s9  ;;  %p3078_p3 = scmp.lt.s32.totalorder %s3072_s9, %s3072_s9 }
  0x67   :  { %p3079_p4 = por %p3078_p3, %p3077_p2 }
  0x69   :  { %p3080_p5 = pnand %p3079_p4, %p3073_p1 }
  0x6b   :  { %3083 = shalt.err (!%p3080_p5)
}
  0x6c   :  { %36 = dma.hbm_to_vmem [thread:$0]  %s3936_s0, 256, %s31_s15, [#allocation3], %s3257_s22, %s3257_s22, %s3258_s28  }
  0x6d   :  { %s3084_s29 = scalar_lea.hbm %s3938_s2, 16 }
  0x6e   :  { %p3085_p6 = scmp.ne.s32.totalorder %s3938_s2, %s3084_s29  ;;  %p3088_p7 = scmp.lt.u32.totalorder %s3084_s29, %s3938_s2 }
  0x70   :  { %p3090_p8 = pnand %p3088_p7, %p3085_p6 }
  0x72   :  { %3093 = shalt.err (!%p3090_p8)
}
  0x73   :  { %s3094_s14 = scalar_lea.vmem %s54_s18, 16  ;;  %s3098_s16 = scalar_lea.vmem %s54_s18, 32 }
  0x74   :  { %p3095_p9 = scmp.ne.s32.totalorder %s54_s18, %s3094_s14  ;;  %p3099_p10 = scmp.lt.s32.totalorder %s54_s18, %s54_s18 }
  0x75   :  { %p3100_p11 = scmp.lt.s32.totalorder %s3098_s16, %s3094_s14 }
  0x77   :  { %p3101_p12 = por %p3100_p11, %p3099_p10 }
  0x79   :  { %p3102_p13 = pnand %p3101_p12, %p3095_p9 }
  0x7b   :  { %3105 = shalt.err (!%p3102_p13)
}
  0x7c   :  { %56 = dma.hbm_to_vmem [thread:$0]  %s3938_s2, 16, %s54_s18, [#allocation6]  }
  0x7d   :  { %s3263_s5 = smov [#allocation10]   ;;  %s3106_s23 = scalar_lea.hbm %s3940_s4, 512 }
  0x7e   :  { %s74_s19 = sshll.u32 %s3263_s5, 4  ;;  %p3107_p0 = scmp.ne.s32.totalorder %s3940_s4, %s3106_s23  ;;  %s75_s19 = int_to_ptr.vmem [resolvable:$true] %s74_s19 }
  0x7f   :  { %p3110_p1 = scmp.lt.u32.totalorder %s3106_s23, %s3940_s4 }
  0x81   :  { %p3112_p2 = pnand %p3110_p1, %p3107_p0 }
  0x83   :  { %3115 = shalt.err (!%p3112_p2)
}
  0x84   :  { %s3116_s17 = scalar_lea.vmem %s75_s19, 512  ;;  %p3121_p4 = scmp.lt.s32.totalorder %s75_s19, %s75_s19 }
  0x85   :  { %p3117_p3 = scmp.ne.s32.totalorder %s75_s19, %s3116_s17  ;;  %p3122_p5 = scmp.lt.s32.totalorder %s3116_s17, %s3116_s17 }
  0x87   :  { %p3123_p6 = por %p3122_p5, %p3121_p4 }
  0x89   :  { %p3124_p7 = pnand %p3123_p6, %p3117_p3 }
  0x8b   :  { %3127 = shalt.err (!%p3124_p7)
}
  0x8c   :  { %s3264_s2 = smov 64   ;;  %s3265_s18 = smov 4  }
  0x8d   :  { %80 = dma.hbm_to_vmem [thread:$0]  %s3940_s4, 512, %s75_s19, [#allocation9], %s3264_s2, %s3264_s2, %s3265_s18  }
  0x8e   :  { %s3266_s29 = smov [#allocation13]   ;;  %s3267_s13 = smov [#allocation16]  }
  0x8f   :  { %s97_s30 = sshll.u32 %s3266_s29, 4  ;;  %s116_s7 = sshll.u32 %s3267_s13, 4  ;;  %s98_s30 = int_to_ptr.vmem [resolvable:$true] %s97_s30  ;;  %s3452_s7 = int_to_ptr.vmem [resolvable:$true] %s116_s7 }
  0x90   :  { %s3128_s16 = scalar_lea.hbm %s3942_s6, 16 }
  0x91   :  { %p3129_p8 = scmp.ne.s32.totalorder %s3942_s6, %s3128_s16  ;;  %p3132_p9 = scmp.lt.u32.totalorder %s3128_s16, %s3942_s6 }
  0x93   :  { %p3134_p10 = pnand %p3132_p9, %p3129_p8 }
  0x95   :  { %3137 = shalt.err (!%p3134_p10)
}
  0x96   :  { %s3138_s4 = scalar_lea.vmem %s98_s30, 16  ;;  %s3142_s19 = scalar_lea.vmem %s98_s30, 32 }
  0x97   :  { %p3139_p11 = scmp.ne.s32.totalorder %s98_s30, %s3138_s4  ;;  %p3143_p12 = scmp.lt.s32.totalorder %s98_s30, %s98_s30 }
  0x98   :  { %p3144_p13 = scmp.lt.s32.totalorder %s3142_s19, %s3138_s4 }
  0x9a   :  { %p3145_p0 = por %p3144_p13, %p3143_p12 }
  0x9c   :  { %p3146_p1 = pnand %p3145_p0, %p3139_p11 }
  0x9e   :  { %3149 = shalt.err (!%p3146_p1)
}
  0x9f   :  { %100 = dma.hbm_to_vmem [thread:$0]  %s3942_s6, 16, %s98_s30, [#allocation12]  }
  0xa0   :  { %s3150_s9 = scalar_lea.hbm %s3944_s8, 256 }
  0xa1   :  { %p3151_p2 = scmp.ne.s32.totalorder %s3944_s8, %s3150_s9  ;;  %p3154_p3 = scmp.lt.u32.totalorder %s3150_s9, %s3944_s8 }
  0xa3   :  { %p3156_p4 = pnand %p3154_p3, %p3151_p2 }
  0xa5   :  { %3159 = shalt.err (!%p3156_p4)
}
  0xa6   :  { %s3160_s29 = scalar_lea.vmem %s3452_s7, 256  ;;  %p3165_p6 = scmp.lt.s32.totalorder %s3452_s7, %s3452_s7 }
  0xa7   :  { %p3161_p5 = scmp.ne.s32.totalorder %s3452_s7, %s3160_s29  ;;  %p3166_p7 = scmp.lt.s32.totalorder %s3160_s29, %s3160_s29 }
  0xa9   :  { %p3167_p8 = por %p3166_p7, %p3165_p6 }
  0xab   :  { %p3168_p9 = pnand %p3167_p8, %p3161_p5 }
  0xad   :  { %3171 = shalt.err (!%p3168_p9)
}
  0xae   :  { %122 = dma.hbm_to_vmem [thread:$0]  %s3944_s8, 256, %s3452_s7, [#allocation15], %s3264_s2, %s3264_s2, %s3265_s18  }
  0xaf   :  { %s3268_s13 = smov [#allocation19]   ;;  %s3269_s14 = smov [#allocation20]  }
  0xb0   :  { %s138_s26 = sshll.u32 %s3268_s13, 4  ;;  %s151_s16 = sshll.u32 %s3269_s14, 4  ;;  %s139_s26 = int_to_ptr.vmem [resolvable:$true] %s138_s26  ;;  %s152_s16 = int_to_ptr.vmem [resolvable:$true] %s151_s16 }
  0xb1   :  { %s3172_s5 = scalar_lea.hbm %s3946_s10, 512 }
  0xb2   :  { %p3173_p10 = scmp.ne.s32.totalorder %s3946_s10, %s3172_s5  ;;  %p3176_p11 = scmp.lt.u32.totalorder %s3172_s5, %s3946_s10 }
  0xb4   :  { %p3178_p12 = pnand %p3176_p11, %p3173_p10 }
  0xb6   :  { %3181 = shalt.err (!%p3178_p12)
}
  0xb7   :  { %s3182_s8 = scalar_lea.vmem %s139_s26, 512  ;;  %p3187_p0 = scmp.lt.s32.totalorder %s139_s26, %s139_s26 }
  0xb8   :  { %p3183_p13 = scmp.ne.s32.totalorder %s139_s26, %s3182_s8  ;;  %p3188_p1 = scmp.lt.s32.totalorder %s3182_s8, %s3182_s8 }
  0xba   :  { %p3189_p2 = por %p3188_p1, %p3187_p0 }
  0xbc   :  { %p3190_p3 = pnand %p3189_p2, %p3183_p13 }
  0xbe   :  { %3193 = shalt.err (!%p3190_p3)
}
  0xbf   :  { %144 = dma.hbm_to_vmem [thread:$0]  %s3946_s10, 512, %s139_s26, [#allocation18], %s3264_s2, %s3264_s2, %s3265_s18  }
  0xc0   :  { %s3194_s9 = scalar_lea.hbm %s3947_s11, 16 }
  0xc1   :  { %p3195_p4 = scmp.ne.s32.totalorder %s3947_s11, %s3194_s9  ;;  %p3198_p5 = scmp.lt.u32.totalorder %s3194_s9, %s3947_s11 }
  0xc3   :  { %p3200_p6 = pnand %p3198_p5, %p3195_p4 }
  0xc5   :  { %3203 = shalt.err (!%p3200_p6)
}
  0xc6   :  { %s3204_s29 = scalar_lea.vmem %s152_s16, 16  ;;  %s3208_s6 = scalar_lea.vmem %s152_s16, 32 }
  0xc7   :  { %p3205_p7 = scmp.ne.s32.totalorder %s152_s16, %s3204_s29  ;;  %p3209_p8 = scmp.lt.s32.totalorder %s152_s16, %s152_s16 }
  0xc8   :  { %p3210_p9 = scmp.lt.s32.totalorder %s3208_s6, %s3204_s29 }
  0xca   :  { %p3211_p10 = por %p3210_p9, %p3209_p8 }
  0xcc   :  { %p3212_p11 = pnand %p3211_p10, %p3205_p7 }
  0xce   :  { %3215 = shalt.err (!%p3212_p11)
}
  0xcf   :  { %154 = dma.hbm_to_vmem [thread:$0]  %s3947_s11, 16, %s152_s16, [#allocation21]  }
  0xd0   :  { %3238 = dma.done.wait [#allocation3], 256  }
  0xd1   :  { %3239 = vsyncadd [#allocation3], 4294967040 }
  0xd2   :  { %3240 = dma.done.wait [#allocation6], 32  }
  0xd3   :  { %3241 = vsyncadd [#allocation6], 4294967264 }
  0xd4   :  { %3242 = dma.done.wait [#allocation9], 1024  }
  0xd5   :  { %3243 = vsyncadd [#allocation9], 4294966272 }
  0xd6   :  { %3244 = dma.done.wait [#allocation12], 32  }
  0xd7   :  { %3245 = vsyncadd [#allocation12], 4294967264 }
  0xd8   :  { %3246 = dma.done.wait [#allocation15], 272  }
  0xd9   :  { %3247 = vsyncadd [#allocation15], 4294967024 }
  0xda   :  { %3248 = dma.done.wait [#allocation18], 528  }
  0xdb   :  { %3249 = vsyncadd [#allocation18], 4294966768 }
  0xdc   :  { %3250 = dma.done.wait [#allocation21], 16  }
  0xdd   :  { %3251 = vsyncadd [#allocation21], 4294967280  ;;  %vm196_vm0 = vcmask 261120   ;;  %v192_v0 = vld [vmem:[#allocation2] sm:$0xff]  ;;  %v193_v1 = vld [vmem:[#allocation2 + $0x8] sm:$0xff]  ;;  %v3270_v18 = vmov 0   ;;  %v346_v44 = vlaneseq }
  0xde   :  { %v197_v2 = vsel %vm196_vm0, %v192_v0, 0.0  ;;  %v200_v3 = vsel %vm196_vm0, %v193_v1, 0.0  ;;  %v2890_v14 = vld [vmem:[#allocation8 + $0x4] ss:$8 sps:$4 sm:$0xff]   ;;  %v2892_v15 = vld [vmem:[#allocation8] ss:$8 sps:$4 sm:$0xff]   ;;  %300 = vmatprep.mubr.bf16.mxu1 %v3270_v18  ;;  %v3527_v51 = vpack.i.b16 %v3270_v18, %v3270_v18 }
  0xdf   :  { %198 = vadd.xlane.f32.xlu0 %v197_v2  ;;  %268 = vmatprep.subr.bf16.mxu1 %v2890_v14  ;;  %v2893_v16 = vld [vmem:[#allocation8 + $0x14] ss:$8 sps:$4 sm:$0xff]   ;;  %v2895_v17 = vld [vmem:[#allocation8 + $0x10] ss:$8 sps:$4 sm:$0xff]   ;;  %s3271_s11 = smov 96   ;;  %s3272_s30 = smov 112  }
  0xe0   :  { %269 = vmatpush1.bf16.msra.mxu1 %v2892_v15  ;;  %v2636_v27 = vld [vmem:[#allocation5] ss:$0 sm:$0xff]  ;;  %v2637_v31 = vld [vmem:[#allocation7] ss:$0 sm:$0xff]  ;;  %s3273_s13 = smov 80   ;;  %v347_v48 = vshrl.u32 %v346_v44, 7 }
  0xe1   :  { %270 = vmatprep.subr.bf16.mxu1 %v2893_v16  ;;  %v3274_v42 = vmov 1983009808   ;;  %v3275_v45 = vmov 1934713408   ;;  %vm3277_vm1 = vmmov 0   ;;  %vm1157_vm2 = vcmask 130048  }
  0xe2   :  { %v344_v43 = vunpack.c.l.s4 %v3274_v42  ;;  %v375_v46 = vunpack.c.l.s4 %v3275_v45  ;;  %vm1526_vm3 = vcmask 64512   ;;  %vm1618_vm4 = vcmask 1043456   ;;  %s3279_s26 = smov 16   ;;  %s3280_s14 = smov 48  }
  0xe3   :  { %201 = vadd.xlane.f32.xlu0 %v200_v3  ;;  %v3276_v3 = vmov 0.0   ;;  %vm2315_vm5 = vcmask 392192   ;;  %vm2357_vm6 = vcmask 523264   ;;  %s3281_s16 = smov [#allocation22]  }
  0xe4   :  { %271 = vmatpush1.bf16.msra.mxu1 %v2895_v17  ;;  %v345_v47 = vunpack.c.0.s8 %v344_v43  ;;  %v376_v55 = vunpack.c.0.s8 %v375_v46  ;;  %2740 = vmatprep.subr.bf16.mxu0 %v3276_v3  ;;  %s2618_s0 = sshll.u32 %s3281_s16, 4  ;;  %s2619_s0 = int_to_ptr.vmem [resolvable:$true] %s2618_s0 }
  0xe5   :  { %2734 = vmatprep.subr.bf16.mxu1 %v3276_v3  ;;  %2742 = vmatprep.mubr.msk.bf16.mxu0 %vm3277_vm1, %v3276_v3  ;;  %s3216_s15 = scalar_lea.vmem %s2619_s0, 256  ;;  %p3221_p13 = scmp.lt.s32.totalorder %s2619_s0, %s2619_s0 }
  0xe6   :  { %v3531_v56 = vsub.s32 %v345_v47, %v347_v48  ;;  %v3535_v62 = vsub.s32 %v376_v55, %v347_v48  ;;  %p3217_p12 = scmp.ne.s32.totalorder %s2619_s0, %s3216_s15  ;;  %p3222_p0 = scmp.lt.s32.totalorder %s3216_s15, %s3216_s15 }
  0xe8   :  { %p3223_p1 = por %p3222_p0, %p3221_p13 }
  0xea   :  { %p3224_p2 = pnand %p3223_p1, %p3217_p12 }
 0x16c   :  { %v199_v4 = vpop.xlane.xlu0 %198 }
 0x16d   :  { %v204_v5 = vmul.f32 0.03125, %v199_v4 }
 0x16f   :  { %v206_v6 = vsub.f32 %v192_v0, %v204_v5 }
 0x170   :  { %v202_v7 = vpop.xlane.xlu0 %201 }
 0x171   :  { %v205_v8 = vmul.f32 0.03125, %v202_v7  ;;  %v208_v9 = vmul.f32 %v206_v6, %v206_v6 }
 0x173   :  { %v207_v10 = vsub.f32 %v193_v1, %v205_v8  ;;  %v210_v11 = vsel %vm196_vm0, %v208_v9, 0.0 }
 0x174   :  { %211 = vadd.xlane.f32.xlu1 %v210_v11 }
 0x175   :  { %v209_v12 = vmul.f32 %v207_v10, %v207_v10 }
 0x177   :  { %v213_v13 = vsel %vm196_vm0, %v209_v12, 0.0 }
 0x178   :  { %214 = vadd.xlane.f32.xlu1 %v213_v13 }
 0x201   :  { %v212_v19 = vpop.xlane.xlu1 %211 }
 0x202   :  { %v216_v20 = vmul.f32 0.03125, %v212_v19 }
 0x204   :  { %v218_v21 = vadd.f32 1e-05, %v216_v20 }
 0x205   :  { %v215_v22 = vpop.xlane.xlu1 %214 }
 0x206   :  { %2906 = vrsqrt.f32 %v218_v21  ;;  %v217_v23 = vmul.f32 0.03125, %v215_v22 }
 0x208   :  { %v219_v24 = vadd.f32 1e-05, %v217_v23 }
 0x20a   :  { %2908 = vrsqrt.f32 %v219_v24 }
 0x210   :  { %v2907_v25 = vpop.eup %2906 }
 0x211   :  { %v222_v26 = vmul.f32 %v2907_v25, %v206_v6 }
 0x213   :  { %v230_v30 = vmul.f32 %v2636_v27, %v222_v26 }
 0x214   :  { %v2909_v28 = vpop.eup %2908 }
 0x215   :  { %v223_v29 = vmul.f32 %v2909_v28, %v207_v10  ;;  %v238_v33 = vadd.f32 %v2637_v31, %v230_v30 }
 0x217   :  { %v231_v32 = vmul.f32 %v2636_v27, %v223_v29 }
 0x219   :  { %v239_v34 = vadd.f32 %v2637_v31, %v231_v32 }
 0x21b   :  { %v240_v35 = vpack.c.bf16 %v239_v34, %v238_v33 }
 0x21d   :  { %2642 = vmatmul.mubr.msk.bf16.vlgmr.msra.gmra.mrb[0].mxu1 %vm196_vm0, %v240_v35 }
 0x21e   :  { %2736 = vmatprep.mubr.msk.bf16.mxu1 %vm3277_vm1, %v3276_v3 }
 0x2f0   :  { %v302_v36 = vpop.f32.mrb[0].mxu1 }
 0x2f1   :  { %v304_v37 = vpop.f32.mrb[1].mxu1 }
 0x2f2   :  { %v306_v38 = vpop.f32.mrb[2].mxu1 }
 0x2f3   :  { %v311_v39 = vpack.c.bf16 %v306_v38, %v302_v36  ;;  %v308_v40 = vpop.f32.mrb[3].mxu1 }
 0x2f4   :  { %v3519_v41 = vpack.c.bf16 %v308_v40, %v304_v37 }
 0x2f5   :  { %316 = vrot.lane.b32.xlu1 %v311_v39, %s3271_s11  ;;  %314 = vrot.lane.b32.xlu0 %v311_v39, %s3272_s30  ;;  %v324_v54 = vshrl.u32 %v311_v39, 16 }
 0x2f9   :  { %318 = vrot.lane.b32.xlu1 %v311_v39, %s3273_s13 }
 0x2fd   :  { %598 = vrot.lane.b32.xlu1 %v311_v39, %s3264_s2 }
 0x367   :  { %v317_v49 = vpop.permute.xlu1 %316  ;;  %v315_v50 = vpop.permute.xlu0 %314 }
 0x368   :  { %v322_v52 = vpack.i.b16 %v315_v50, %v311_v39  ;;  %v325_v53 = vshrl.u32 %v315_v50, 16  ;;  %602 = vrot.lane.b32.xlu1 %v317_v49, %s3264_s2  ;;  %600 = vrot.lane.b32.xlu0 %v315_v50, %s3264_s2  ;;  %v332_v61 = vshrl.u32 %v317_v49, 16 }
 0x36a   :  { %v326_v57 = vpack.i.b16 %v325_v53, %v324_v54  ;;  %v342_v59 = vcombine.high %v322_v52, %v3527_v51  ;;  %v349_v0 = vrot.slane %v322_v52, %v3531_v56 }
 0x36b   :  { %v319_v58 = vpop.permute.xlu1 %318 }
 0x36c   :  { %v330_v60 = vpack.i.b16 %v319_v58, %v317_v49  ;;  %604 = vrot.lane.b32.xlu0 %v319_v58, %s3264_s2  ;;  %v333_v63 = vshrl.u32 %v319_v58, 16  ;;  %v408_v4 = vcombine.high %v326_v57, %v3527_v51  ;;  %v356_v6 = vrot.slane %v342_v59, %v3531_v56  ;;  %s3278_s2 = smov 32  }
 0x36d   :  { %v415_v10 = vrot.slane %v326_v57, %v3531_v56 }
 0x36e   :  { %v357_v1 = vcombine.high %v330_v60, %v3527_v51  ;;  %v364_v2 = vrot.slane %v330_v60, %v3531_v56  ;;  %v334_v5 = vpack.i.b16 %v333_v63, %v332_v61  ;;  %v422_v17 = vrot.slane %v408_v4, %v3531_v56 }
 0x370   :  { %v371_v7 = vrot.slane %v357_v1, %v3531_v56  ;;  %v372_v8 = vcombine.low %v349_v0, %v364_v2  ;;  %v373_v9 = vcombine.high %v349_v0, %v364_v2  ;;  %v423_v11 = vcombine.high %v334_v5, %v3527_v51 }
 0x371   :  { %v430_v12 = vrot.slane %v334_v5, %v3531_v56 }
 0x372   :  { %v380_v13 = vrot.slane %v372_v8, %v3535_v62  ;;  %v387_v14 = vrot.slane %v373_v9, %v3535_v62  ;;  %v388_v15 = vcombine.low %v356_v6, %v371_v7  ;;  %v389_v16 = vcombine.high %v356_v6, %v371_v7 }
 0x373   :  { %v437_v19 = vrot.slane %v423_v11, %v3531_v56  ;;  %v438_v20 = vcombine.low %v415_v10, %v430_v12  ;;  %v439_v21 = vcombine.high %v415_v10, %v430_v12 }
 0x374   :  { %v396_v22 = vrot.slane %v388_v15, %v3535_v62  ;;  %v403_v23 = vrot.slane %v389_v16, %v3535_v62  ;;  %v474_v24 = vcombine.low %v380_v13, %v387_v14  ;;  %v2643_v25 = vcombine.high %v380_v13, %v387_v14  ;;  %v599_v15 = vpop.permute.xlu1 %598 }
 0x375   :  { %v446_v26 = vrot.slane %v438_v20, %v3535_v62  ;;  %v453_v27 = vrot.slane %v439_v21, %v3535_v62  ;;  %v454_v28 = vcombine.low %v422_v17, %v437_v19  ;;  %v455_v29 = vcombine.high %v422_v17, %v437_v19 }
 0x376   :  { %v481_v30 = vrot.slane %v474_v24, %v3531_v56  ;;  %v489_v31 = vrot.slane %v2643_v25, %v3531_v56  ;;  %v524_v32 = vcombine.low %v396_v22, %v403_v23  ;;  %v2645_v33 = vcombine.high %v396_v22, %v403_v23 }
 0x377   :  { %v462_v34 = vrot.slane %v454_v28, %v3535_v62  ;;  %v469_v35 = vrot.slane %v455_v29, %v3535_v62  ;;  %v499_v36 = vcombine.low %v446_v26, %v453_v27  ;;  %v2644_v37 = vcombine.high %v446_v26, %v453_v27 }
 0x378   :  { %v490_v38 = vcombine.low %v481_v30, %v489_v31  ;;  %v531_v39 = vrot.slane %v524_v32, %v3531_v56  ;;  %v539_v40 = vrot.slane %v2645_v33, %v3531_v56  ;;  %v610_v19 = vshrl.u32 %v599_v15, 16 }
 0x379   :  { %v506_v42 = vrot.slane %v499_v36, %v3531_v56  ;;  %v514_v43 = vrot.slane %v2644_v37, %v3531_v56  ;;  %v549_v44 = vcombine.low %v462_v34, %v469_v35  ;;  %v2646_v45 = vcombine.high %v462_v34, %v469_v35 }
 0x37a   :  { %v540_v46 = vcombine.low %v531_v39, %v539_v40  ;;  %v3567_v47 = vrot.slane %v490_v38, %v3535_v62 }
 0x37b   :  { %v515_v48 = vcombine.low %v506_v42, %v514_v43  ;;  %v556_v49 = vrot.slane %v549_v44, %v3531_v56  ;;  %v564_v50 = vrot.slane %v2646_v45, %v3531_v56 }
 0x37c   :  { %v3575_v52 = vcombine.high %v3567_v47, %v3270_v18  ;;  %v3578_v53 = vrot.slane %v540_v46, %v3535_v62  ;;  %v577_v57 = vshrl.u32 %v3567_v47, 16 }
 0x37d   :  { %v3581_v54 = vrot.slane %v515_v48, %v3535_v62  ;;  %v565_v55 = vcombine.low %v556_v49, %v564_v50 }
 0x37e   :  { %v583_v63 = vshrl.u32 %v3575_v52, 16  ;;  %v3597_v0 = vcombine.high %v3578_v53, %v3270_v18  ;;  %v589_v6 = vshrl.u32 %v3578_v53, 16 }
 0x37f   :  { %v576_v58 = vpack.i.b16 %v3581_v54, %v3567_v47  ;;  %v578_v59 = vshrl.u32 %v3581_v54, 16  ;;  %v3589_v60 = vcombine.high %v3581_v54, %v3270_v18  ;;  %v3592_v61 = vrot.slane %v565_v55, %v3535_v62 }
 0x380   :  { %v595_v12 = vshrl.u32 %v3597_v0, 16 }
 0x381   :  { %v3599_v1 = vpack.i.b16 %v578_v59, %v577_v57  ;;  %v582_v2 = vpack.i.b16 %v3589_v60, %v3575_v52  ;;  %v584_v4 = vshrl.u32 %v3589_v60, 16  ;;  %v588_v5 = vpack.i.b16 %v3592_v61, %v3578_v53 }
 0x382   :  { %v590_v7 = vshrl.u32 %v3592_v61, 16  ;;  %v3610_v8 = vcombine.high %v3592_v61, %v3270_v18 }
 0x383   :  { %v3612_v9 = vpack.i.b16 %v584_v4, %v583_v63 }
 0x384   :  { %v3614_v10 = vpack.i.b16 %v590_v7, %v589_v6  ;;  %v594_v11 = vpack.i.b16 %v3610_v8, %v3597_v0  ;;  %v596_v13 = vshrl.u32 %v3610_v8, 16 }
 0x386   :  { %v3620_v14 = vpack.i.b16 %v596_v13, %v595_v12 }
 0x3da   :  { %v601_v16 = vpop.permute.xlu0 %600  ;;  %v603_v20 = vpop.permute.xlu1 %602 }
 0x3db   :  { %v611_v17 = vshrl.u32 %v601_v16, 16  ;;  %v608_v21 = vpack.i.b16 %v601_v16, %v599_v15  ;;  %v618_v25 = vshrl.u32 %v603_v20, 16 }
 0x3dd   :  { %v612_v22 = vpack.i.b16 %v611_v17, %v610_v19  ;;  %v622_v27 = vcombine.high %v608_v21, %v3527_v51  ;;  %v629_v28 = vrot.slane %v608_v21, %v3531_v56 }
 0x3de   :  { %v605_v23 = vpop.permute.xlu0 %604 }
 0x3df   :  { %v616_v24 = vpack.i.b16 %v605_v23, %v603_v20  ;;  %v619_v26 = vshrl.u32 %v605_v23, 16  ;;  %v688_v31 = vcombine.high %v612_v22, %v3527_v51  ;;  %v695_v36 = vrot.slane %v612_v22, %v3531_v56 }
 0x3e0   :  { %v636_v39 = vrot.slane %v622_v27, %v3531_v56 }
 0x3e1   :  { %v637_v29 = vcombine.high %v616_v24, %v3527_v51  ;;  %v644_v30 = vrot.slane %v616_v24, %v3531_v56  ;;  %v620_v32 = vpack.i.b16 %v619_v26, %v618_v25  ;;  %v702_v43 = vrot.slane %v688_v31, %v3531_v56 }
 0x3e3   :  { %v651_v33 = vrot.slane %v637_v29, %v3531_v56  ;;  %v652_v34 = vcombine.low %v629_v28, %v644_v30  ;;  %v653_v35 = vcombine.high %v629_v28, %v644_v30  ;;  %v703_v37 = vcombine.high %v620_v32, %v3527_v51 }
 0x3e4   :  { %v710_v38 = vrot.slane %v620_v32, %v3531_v56 }
 0x3e5   :  { %v660_v40 = vrot.slane %v652_v34, %v3535_v62  ;;  %v667_v42 = vrot.slane %v653_v35, %v3535_v62  ;;  %v717_v44 = vrot.slane %v703_v37, %v3531_v56  ;;  %v668_v48 = vcombine.low %v636_v39, %v651_v33 }
 0x3e6   :  { %v718_v45 = vcombine.low %v695_v36, %v710_v38  ;;  %v719_v46 = vcombine.high %v695_v36, %v710_v38  ;;  %v669_v49 = vcombine.high %v636_v39, %v651_v33 }
 0x3e7   :  { %v754_v50 = vcombine.low %v660_v40, %v667_v42  ;;  %v2647_v55 = vcombine.high %v660_v40, %v667_v42  ;;  %v734_v63 = vcombine.low %v702_v43, %v717_v44  ;;  %v735_v4 = vcombine.high %v702_v43, %v717_v44 }
 0x3e8   :  { %v726_v57 = vrot.slane %v718_v45, %v3535_v62  ;;  %v733_v59 = vrot.slane %v719_v46, %v3535_v62  ;;  %v676_v17 = vrot.slane %v668_v48, %v3535_v62  ;;  %v683_v19 = vrot.slane %v669_v49, %v3535_v62 }
 0x3e9   :  { %v761_v6 = vrot.slane %v754_v50, %v3531_v56  ;;  %v769_v7 = vrot.slane %v2647_v55, %v3531_v56  ;;  %v742_v12 = vrot.slane %v734_v63, %v3535_v62  ;;  %v749_v13 = vrot.slane %v735_v4, %v3535_v62 }
 0x3ea   :  { %v779_v15 = vcombine.low %v726_v57, %v733_v59  ;;  %v2648_v16 = vcombine.high %v726_v57, %v733_v59  ;;  %v804_v27 = vcombine.low %v676_v17, %v683_v19  ;;  %v2649_v28 = vcombine.high %v676_v17, %v683_v19 }
 0x3eb   :  { %v770_v20 = vcombine.low %v761_v6, %v769_v7  ;;  %v829_v23 = vcombine.low %v742_v12, %v749_v13  ;;  %v2650_v24 = vcombine.high %v742_v12, %v749_v13 }
 0x3ec   :  { %v786_v21 = vrot.slane %v779_v15, %v3531_v56  ;;  %v794_v22 = vrot.slane %v2648_v16, %v3531_v56  ;;  %v811_v36 = vrot.slane %v804_v27, %v3531_v56  ;;  %v819_v37 = vrot.slane %v2649_v28, %v3531_v56 }
 0x3ed   :  { %v777_v25 = vrot.slane %v770_v20, %v3535_v62  ;;  %v836_v30 = vrot.slane %v829_v23, %v3531_v56  ;;  %v844_v31 = vrot.slane %v2650_v24, %v3531_v56 }
 0x3ee   :  { %v795_v26 = vcombine.low %v786_v21, %v794_v22  ;;  %v820_v48 = vcombine.low %v811_v36, %v819_v37 }
 0x3ef   :  { %v857_v33 = vshrl.u32 %v777_v25, 16  ;;  %v778_v40 = vcombine.high %v777_v25, %v3270_v18  ;;  %v845_v44 = vcombine.low %v836_v30, %v844_v31 }
 0x3f0   :  { %v802_v29 = vrot.slane %v795_v26, %v3535_v62  ;;  %v827_v57 = vrot.slane %v820_v48, %v3535_v62 }
 0x3f1   :  { %v863_v46 = vshrl.u32 %v778_v40, 16  ;;  %v852_v50 = vrot.slane %v845_v44, %v3535_v62 }
 0x3f2   :  { %v856_v32 = vpack.i.b16 %v802_v29, %v777_v25  ;;  %v858_v34 = vshrl.u32 %v802_v29, 16  ;;  %v803_v35 = vcombine.high %v802_v29, %v3270_v18  ;;  %v869_v54 = vshrl.u32 %v827_v57, 16 }
 0x3f3   :  { %v870_v63 = vshrl.u32 %v852_v50, 16  ;;  %v868_v47 = vpack.i.b16 %v852_v50, %v827_v57  ;;  %v853_v4 = vcombine.high %v852_v50, %v3270_v18  ;;  %v828_v6 = vcombine.high %v827_v57, %v3270_v18 }
 0x3f4   :  { %v1162_v38 = vsel %vm1157_vm2, %v856_v32, 0  ;;  %v859_v39 = vpack.i.b16 %v858_v34, %v857_v33  ;;  %v864_v43 = vshrl.u32 %v803_v35, 16  ;;  %v862_v45 = vpack.i.b16 %v803_v35, %v778_v40 }
 0x3f5   :  { %2735 = vmatpush3.bf16.xpose.msra.mxu1 %v1162_v38  ;;  %v876_v12 = vshrl.u32 %v853_v4, 16  ;;  %v874_v52 = vpack.i.b16 %v853_v4, %v828_v6  ;;  %v875_v60 = vshrl.u32 %v828_v6, 16  ;;  %v889_v6 = vshrl.u32 %v3519_v41, 16 }
 0x3f6   :  { %v1208_v42 = vsel %vm1157_vm2, %v859_v39, 0  ;;  %2746 = vmatprep.subr.bf16.mxu1 %v3276_v3  ;;  %v865_v49 = vpack.i.b16 %v864_v43, %v863_v46  ;;  %v1254_v55 = vsel %vm1157_vm2, %v862_v45, 0 }
 0x3f7   :  { %2741 = vmatpush3.bf16.xpose.msra.mxu0 %v1208_v42 }
 0x3f8   :  { %2752 = vmatprep.subr.bf16.mxu0 %v3276_v3  ;;  %v1300_v59 = vsel %vm1157_vm2, %v865_v49, 0 }
 0x3fc   :  { %2737 = vmatmul.mubr.msk.bf16.vlgmr.msra.gmra.mrb[4].mxu1 %vm1157_vm2, %v576_v58  ;;  %v871_v58 = vpack.i.b16 %v870_v63, %v869_v54 }
 0x3fd   :  { %2747 = vmatpush3.bf16.xpose.msra.mxu1 %v1254_v55  ;;  %2748 = vmatprep.mubr.msk.bf16.mxu1 %vm3277_vm1, %v3276_v3 }
 0x3fe   :  { %2743 = vmatmul.mubr.msk.bf16.vlgmr.msra.gmra.mrb[0].mxu0 %vm1157_vm2, %v3599_v1  ;;  %2758 = vmatprep.subr.bf16.mxu1 %v3276_v3  ;;  %v1346_v1 = vsel %vm1157_vm2, %v868_v47, 0  ;;  %v1392_v7 = vsel %vm1157_vm2, %v871_v58, 0 }
 0x3ff   :  { %2753 = vmatpush3.bf16.xpose.msra.mxu0 %v1300_v59  ;;  %2754 = vmatprep.mubr.msk.bf16.mxu0 %vm3277_vm1, %v3276_v3 }
 0x400   :  { %2764 = vmatprep.subr.bf16.mxu0 %v3276_v3 }
 0x404   :  { %2749 = vmatmul.mubr.msk.bf16.vlgmr.msra.gmra.mrb[8].mxu1 %vm1157_vm2, %v582_v2  ;;  %v877_v2 = vpack.i.b16 %v876_v12, %v875_v60 }
 0x405   :  { %2759 = vmatpush3.bf16.xpose.msra.mxu1 %v1346_v1  ;;  %2760 = vmatprep.mubr.msk.bf16.mxu1 %vm3277_vm1, %v3276_v3 }
 0x406   :  { %2755 = vmatmul.mubr.msk.bf16.vlgmr.msra.gmra.mrb[4].mxu0 %vm1157_vm2, %v3612_v9  ;;  %2770 = vmatprep.subr.bf16.mxu1 %v3276_v3  ;;  %v1438_v9 = vsel %vm1157_vm2, %v874_v52, 0  ;;  %v1484_v13 = vsel %vm1157_vm2, %v877_v2, 0 }
 0x407   :  { %2765 = vmatpush3.bf16.xpose.msra.mxu0 %v1392_v7  ;;  %2766 = vmatprep.mubr.msk.bf16.mxu0 %vm3277_vm1, %v3276_v3 }
 0x408   :  { %2776 = vmatprep.subr.bf16.mxu0 %v3276_v3 }
 0x40c   :  { %2761 = vmatmul.mubr.msk.bf16.vlgmr.msra.gmra.mrb[12].mxu1 %vm1157_vm2, %v588_v5 }
 0x40d   :  { %2771 = vmatpush3.bf16.xpose.msra.mxu1 %v1438_v9  ;;  %2772 = vmatprep.mubr.msk.bf16.mxu1 %vm3277_vm1, %v3276_v3 }
 0x40e   :  { %2767 = vmatmul.mubr.msk.bf16.vlgmr.msra.gmra.mrb[8].mxu0 %vm1157_vm2, %v3614_v10  ;;  %2782 = vmatprep.subr.bf16.mxu1 %v3276_v3 }
 0x40f   :  { %2777 = vmatpush3.bf16.xpose.msra.mxu0 %v1484_v13  ;;  %2778 = vmatprep.mubr.msk.bf16.mxu0 %vm3277_vm1, %v3276_v3 }
 0x410   :  { %2788 = vmatprep.subr.bf16.mxu0 %v3276_v3 }
 0x414   :  { %2773 = vmatmul.mubr.msk.bf16.vlgmr.msra.gmra.mrb[16].mxu1 %vm1157_vm2, %v594_v11 }
 0x415   :  { %2784 = vmatprep.mubr.msk.bf16.mxu1 %vm3277_vm1, %v3276_v3 }
 0x416   :  { %2779 = vmatmul.mubr.msk.bf16.vlgmr.msra.gmra.mrb[12].mxu0 %vm1157_vm2, %v3620_v14 }
 0x417   :  { %2790 = vmatprep.mubr.msk.bf16.mxu0 %vm3277_vm1, %v3276_v3 }
 0x4cf   :  { %v1198_v53 = vpop.f32.mrb[4].mxu1 }
 0x4d0   :  { %v2738_v61 = vpop.f32.mrb[5].mxu1  ;;  %v1527_v5 = vsel %vm1526_vm3, %v1198_v53, -inf }
 0x4d1   :  { %v1244_v10 = vpop.f32.mrb[0].mxu0  ;;  %1528 = vmax.xlane.f32.xlu1 %v1527_v5  ;;  %v1201_v15 = vpop.f32.mrb[6].mxu1 }
 0x4d2   :  { %v2739_v0 = vpop.f32.mrb[7].mxu1  ;;  %v2744_v8 = vpop.f32.mrb[1].mxu0  ;;  %v1530_v11 = vsel %vm1526_vm3, %v1244_v10, -inf }
 0x4d3   :  { %1531 = vmax.xlane.f32.xlu0 %v1530_v11  ;;  %v1247_v16 = vpop.f32.mrb[2].mxu0 }
 0x4d4   :  { %v2745_v17 = vpop.f32.mrb[3].mxu0 }
 0x4d7   :  { %v3716_v19 = vpop.f32.mrb[8].mxu1 }
 0x4d8   :  { %v2750_v14 = vpop.f32.mrb[9].mxu1  ;;  %v1533_v43 = vsel %vm1526_vm3, %v3716_v19, -inf }
 0x4d9   :  { %v1293_v20 = vpop.f32.mrb[10].mxu1  ;;  %v3718_v21 = vpop.f32.mrb[4].mxu0 }
 0x4da   :  { %v2751_v22 = vpop.f32.mrb[11].mxu1  ;;  %v2756_v23 = vpop.f32.mrb[5].mxu0  ;;  %v1536_v44 = vsel %vm1526_vm3, %v3718_v21, -inf }
 0x4db   :  { %v1339_v24 = vpop.f32.mrb[6].mxu0 }
 0x4dc   :  { %v2757_v25 = vpop.f32.mrb[7].mxu0 }
 0x4df   :  { %v3720_v26 = vpop.f32.mrb[12].mxu1 }
 0x4e0   :  { %v2762_v27 = vpop.f32.mrb[13].mxu1  ;;  %v1539_v45 = vsel %vm1526_vm3, %v3720_v26, -inf }
 0x4e1   :  { %v1385_v28 = vpop.f32.mrb[14].mxu1  ;;  %v3722_v29 = vpop.f32.mrb[8].mxu0 }
 0x4e2   :  { %v2763_v30 = vpop.f32.mrb[15].mxu1  ;;  %v2768_v31 = vpop.f32.mrb[9].mxu0  ;;  %881 = vrot.lane.b32.xlu1 %v3519_v41, %s3271_s11  ;;  %v1542_v48 = vsel %vm1526_vm3, %v3722_v29, -inf }
 0x4e3   :  { %v1431_v32 = vpop.f32.mrb[10].mxu0 }
 0x4e4   :  { %v2769_v33 = vpop.f32.mrb[11].mxu0 }
 0x4e6   :  { %883 = vrot.lane.b32.xlu1 %v3519_v41, %s3273_s13 }
 0x4e7   :  { %v3728_v34 = vpop.f32.mrb[16].mxu1 }
 0x4e8   :  { %v2774_v35 = vpop.f32.mrb[17].mxu1  ;;  %v1545_v49 = vsel %vm1526_vm3, %v3728_v34, -inf }
 0x4e9   :  { %v1477_v36 = vpop.f32.mrb[18].mxu1  ;;  %v3730_v37 = vpop.f32.mrb[12].mxu0  ;;  %879 = vrot.lane.b32.xlu0 %v3519_v41, %s3272_s30 }
 0x4ea   :  { %v2775_v38 = vpop.f32.mrb[19].mxu1  ;;  %v2780_v39 = vpop.f32.mrb[13].mxu0  ;;  %v1548_v46 = vsel %vm1526_vm3, %v3730_v37, -inf }
 0x4eb   :  { %v1523_v40 = vpop.f32.mrb[14].mxu0 }
 0x4ec   :  { %v2781_v42 = vpop.f32.mrb[15].mxu0 }
 0x508   :  { %1534 = vmax.xlane.f32.xlu0 %v1533_v43 }
 0x50a   :  { %1537 = vmax.xlane.f32.xlu1 %v1536_v44 }
 0x50c   :  { %1540 = vmax.xlane.f32.xlu0 %v1539_v45 }
 0x50e   :  { %1549 = vmax.xlane.f32.xlu1 %v1548_v46 }
 0x510   :  { %1543 = vmax.xlane.f32.xlu0 %v1542_v48 }
 0x514   :  { %1546 = vmax.xlane.f32.xlu0 %v1545_v49 }
 0x55e   :  { %v1529_v50 = vpop.xlane.xlu1 %1528 }
 0x55f   :  { %v1551_v55 = vsub.f32 %v1198_v53, %v1529_v50 }
 0x560   :  { %v1532_v57 = vpop.xlane.xlu0 %1531 }
 0x561   :  { %v1559_v59 = vmul.f32 1.442695, %v1551_v55  ;;  %v1552_v63 = vsub.f32 %v1244_v10, %v1532_v57 }
 0x562   :  { %v882_v47 = vpop.permute.xlu1 %881 }
 0x563   :  { %2910 = vpow2.f32 %v1559_v59  ;;  %v1561_v54 = vmul.f32 1.442695, %v1552_v63  ;;  %v897_v52 = vshrl.u32 %v882_v47, 16 }
 0x564   :  { %v880_v58 = vpop.permute.xlu0 %879 }
 0x565   :  { %2912 = vpow2.f32 %v1561_v54  ;;  %v890_v4 = vshrl.u32 %v880_v58, 16  ;;  %v3747_v1 = vpack.i.b16 %v880_v58, %v3519_v41 }
 0x566   :  { %v884_v7 = vpop.permute.xlu1 %883 }
 0x567   :  { %v3750_v12 = vpack.i.b16 %v884_v7, %v882_v47  ;;  %v3752_v60 = vpack.i.b16 %v890_v4, %v889_v6  ;;  %v898_v2 = vshrl.u32 %v884_v7, 16  ;;  %v908_v9 = vrot.slane %v3747_v1, %v3531_v56 }
 0x569   :  { %v3756_v13 = vpack.i.b16 %v898_v2, %v897_v52  ;;  %v923_v53 = vrot.slane %v3750_v12, %v3531_v56  ;;  %v974_v61 = vrot.slane %v3752_v60, %v3531_v56  ;;  %v967_v4 = vcombine.high %v3752_v60, %v3527_v51 }
 0x56a   :  { %v916_v6 = vcombine.high %v3750_v12, %v3527_v51  ;;  %v901_v52 = vcombine.high %v3747_v1, %v3527_v51 }
 0x56b   :  { %v931_v5 = vcombine.low %v908_v9, %v923_v53  ;;  %v932_v41 = vcombine.high %v908_v9, %v923_v53  ;;  %v989_v10 = vrot.slane %v3756_v13, %v3531_v56  ;;  %v982_v47 = vcombine.high %v3756_v13, %v3527_v51 }
 0x56c   :  { %v981_v60 = vrot.slane %v967_v4, %v3531_v56  ;;  %v930_v12 = vrot.slane %v916_v6, %v3531_v56  ;;  %v915_v9 = vrot.slane %v901_v52, %v3531_v56 }
 0x56d   :  { %v2911_v15 = vpop.eup %2910  ;;  %v939_v0 = vrot.slane %v931_v5, %v3535_v62  ;;  %v946_v8 = vrot.slane %v932_v41, %v3535_v62  ;;  %v997_v11 = vcombine.low %v974_v61, %v989_v10  ;;  %v998_v17 = vcombine.high %v974_v61, %v989_v10 }
 0x56e   :  { %v1575_v14 = vsel %vm1526_vm3, %v2911_v15, 0.0  ;;  %v1607_v59 = vpack.c.bf16 %v2911_v15, %v2911_v15  ;;  %v996_v2 = vrot.slane %v982_v47, %v3531_v56  ;;  %v947_v61 = vcombine.low %v915_v9, %v930_v12 }
 0x56f   :  { %v2913_v16 = vpop.eup %2912  ;;  %v1005_v20 = vrot.slane %v997_v11, %v3535_v62  ;;  %v1033_v22 = vcombine.low %v939_v0, %v946_v8  ;;  %1576 = vadd.xlane.f32.xlu0 %v1575_v14  ;;  %v1012_v23 = vrot.slane %v998_v17, %v3535_v62  ;;  %v2651_v24 = vcombine.high %v939_v0, %v946_v8 }
 0x570   :  { %v1578_v27 = vsel %vm1526_vm3, %v2913_v16, 0.0  ;;  %v1608_v58 = vpack.c.bf16 %v2913_v16, %v2913_v16  ;;  %v1013_v13 = vcombine.low %v981_v60, %v996_v2  ;;  %v1014_v53 = vcombine.high %v981_v60, %v996_v2 }
 0x571   :  { %v1040_v25 = vrot.slane %v1033_v22, %v3531_v56  ;;  %v1048_v28 = vrot.slane %v2651_v24, %v3531_v56  ;;  %v1058_v30 = vcombine.low %v1005_v20, %v1012_v23  ;;  %v2652_v31 = vcombine.high %v1005_v20, %v1012_v23  ;;  %1579 = vadd.xlane.f32.xlu1 %v1578_v27 }
 0x572   :  { %v948_v5 = vcombine.high %v915_v9, %v930_v12  ;;  %v1021_v41 = vrot.slane %v1013_v13, %v3535_v62  ;;  %v1028_v10 = vrot.slane %v1014_v53, %v3535_v62  ;;  %v955_v51 = vrot.slane %v947_v61, %v3535_v62 }
 0x573   :  { %v1065_v32 = vrot.slane %v1058_v30, %v3531_v56  ;;  %v1073_v33 = vrot.slane %v2652_v31, %v3531_v56  ;;  %v1049_v35 = vcombine.low %v1040_v25, %v1048_v28 }
 0x574   :  { %v962_v1 = vrot.slane %v948_v5, %v3535_v62  ;;  %v1108_v15 = vcombine.low %v1021_v41, %v1028_v10  ;;  %v2654_v0 = vcombine.high %v1021_v41, %v1028_v10 }
 0x575   :  { %v1056_v36 = vrot.slane %v1049_v35, %v3535_v62  ;;  %v1074_v38 = vcombine.low %v1065_v32, %v1073_v33 }
 0x576   :  { %v1083_v8 = vcombine.low %v955_v51, %v962_v1  ;;  %v2653_v11 = vcombine.high %v955_v51, %v962_v1  ;;  %v1115_v17 = vrot.slane %v1108_v15, %v3531_v56  ;;  %v1123_v14 = vrot.slane %v2654_v0, %v3531_v56 }
 0x577   :  { %v1081_v39 = vrot.slane %v1074_v38, %v3535_v62  ;;  %v1057_v40 = vcombine.high %v1056_v36, %v3270_v18  ;;  %v1136_v43 = vshrl.u32 %v1056_v36, 16 }
 0x578   :  { %v1090_v22 = vrot.slane %v1083_v8, %v3531_v56  ;;  %v1098_v23 = vrot.slane %v2653_v11, %v3531_v56  ;;  %v1124_v30 = vcombine.low %v1115_v17, %v1123_v14  ;;  %v2896_v8 = vld [vmem:[#allocation10] sm:$0xff]   ;;  %v2897_v11 = vld [vmem:[#allocation10 + $0x8] sm:$0xff]  }
 0x579   :  { %v1135_v42 = vpack.i.b16 %v1081_v39, %v1056_v36  ;;  %v1137_v44 = vshrl.u32 %v1081_v39, 16  ;;  %v1082_v45 = vcombine.high %v1081_v39, %v3270_v18  ;;  %v1142_v46 = vshrl.u32 %v1057_v40, 16 }
 0x57a   :  { %v1099_v35 = vcombine.low %v1090_v22, %v1098_v23  ;;  %v1131_v39 = vrot.slane %v1124_v30, %v3535_v62 }
 0x57b   :  { %v1620_v48 = vsel %vm1618_vm4, %v1135_v42, 0  ;;  %v1138_v49 = vpack.i.b16 %v1137_v44, %v1136_v43  ;;  %v1141_v50 = vpack.i.b16 %v1082_v45, %v1057_v40  ;;  %v1143_v55 = vshrl.u32 %v1082_v45, 16 }
 0x57c   :  { %2783 = vmatpush3.bf16.msra.mxu1 %v1620_v48  ;;  %v1149_v45 = vshrl.u32 %v1131_v39, 16 }
 0x57d   :  { %v1666_v57 = vsel %vm1618_vm4, %v1138_v49, 0  ;;  %2794 = vmatprep.subr.bf16.mxu1 %v3276_v3  ;;  %v1144_v63 = vpack.i.b16 %v1143_v55, %v1142_v46  ;;  %v1712_v54 = vsel %vm1618_vm4, %v1141_v50, 0 }
 0x57e   :  { %2789 = vmatpush3.bf16.msra.mxu0 %v1666_v57 }
 0x57f   :  { %2785 = vmatmul.mubr.msk.bf16.vlgmr.msra.gmra.mrb[20].mxu1 %vm1526_vm3, %v1607_v59  ;;  %2800 = vmatprep.subr.bf16.mxu0 %v3276_v3  ;;  %v1758_v7 = vsel %vm1618_vm4, %v1144_v63, 0 }
 0x580   :  { %2795 = vmatpush3.bf16.msra.mxu1 %v1712_v54  ;;  %2796 = vmatprep.mubr.msk.bf16.mxu1 %vm3277_vm1, %v3276_v3 }
 0x581   :  { %2791 = vmatmul.mubr.msk.bf16.vlgmr.msra.gmra.mrb[16].mxu0 %vm1526_vm3, %v1608_v58  ;;  %2806 = vmatprep.subr.bf16.mxu1 %v3276_v3 }
 0x582   :  { %2801 = vmatpush3.bf16.msra.mxu0 %v1758_v7  ;;  %2802 = vmatprep.mubr.msk.bf16.mxu0 %vm3277_vm1, %v3276_v3 }
 0x583   :  { %2812 = vmatprep.subr.bf16.mxu0 %v3276_v3 }
 0x595   :  { %v1535_v16 = vpop.xlane.xlu0 %1534 }
 0x596   :  { %v1553_v20 = vsub.f32 %v3716_v19, %v1535_v16  ;;  %v2898_v16 = vld [vmem:[#allocation10 + $0x10] sm:$0xff]  }
 0x597   :  { %v1538_v24 = vpop.xlane.xlu1 %1537 }
 0x598   :  { %v1563_v25 = vmul.f32 1.442695, %v1553_v20  ;;  %v1554_v27 = vsub.f32 %v3718_v21, %v1538_v24  ;;  %v1106_v21 = vrot.slane %v1099_v35, %v3535_v62 }
 0x599   :  { %v1541_v28 = vpop.xlane.xlu0 %1540 }
 0x59a   :  { %2914 = vpow2.f32 %v1563_v25  ;;  %v1565_v31 = vmul.f32 1.442695, %v1554_v27  ;;  %v1555_v32 = vsub.f32 %v3720_v26, %v1541_v28  ;;  %v1147_v46 = vpack.i.b16 %v1131_v39, %v1106_v21 }
 0x59b   :  { %v1550_v33 = vpop.xlane.xlu1 %1549  ;;  %v1148_v48 = vshrl.u32 %v1106_v21, 16  ;;  %v1107_v54 = vcombine.high %v1106_v21, %v3270_v18 }
 0x59c   :  { %2916 = vpow2.f32 %v1565_v31  ;;  %v1567_v36 = vmul.f32 1.442695, %v1555_v32  ;;  %v1558_v19 = vsub.f32 %v3730_v37, %v1550_v33  ;;  %v1804_v63 = vsel %vm1618_vm4, %v1147_v46, 0 }
 0x59d   :  { %v1544_v38 = vpop.xlane.xlu0 %1543  ;;  %v1150_v57 = vpack.i.b16 %v1149_v45, %v1148_v48  ;;  %v1154_v2 = vshrl.u32 %v1107_v54, 16 }
 0x59e   :  { %2918 = vpow2.f32 %v1567_v36  ;;  %v1556_v40 = vsub.f32 %v3722_v29, %v1544_v38  ;;  %v1573_v42 = vmul.f32 1.442695, %v1558_v19  ;;  %v1132_v29 = vcombine.high %v1131_v39, %v3270_v18 }
 0x59f   :  { %v1850_v4 = vsel %vm1618_vm4, %v1150_v57, 0 }
 0x5a0   :  { %v1569_v43 = vmul.f32 1.442695, %v1556_v40  ;;  %v1155_v7 = vshrl.u32 %v1132_v29, 16  ;;  %v1153_v52 = vpack.i.b16 %v1132_v29, %v1107_v54 }
 0x5a1   :  { %v1547_v44 = vpop.xlane.xlu0 %1546 }
 0x5a2   :  { %2920 = vpow2.f32 %v1569_v43  ;;  %v1557_v26 = vsub.f32 %v3728_v34, %v1547_v44  ;;  %v1156_v13 = vpack.i.b16 %v1155_v7, %v1154_v2  ;;  %v1896_v61 = vsel %vm1618_vm4, %v1153_v52, 0 }
 0x5a3   :  { %2922 = vpow2.f32 %v1573_v42 }
 0x5a4   :  { %v2915_v49 = vpop.eup %2914  ;;  %v1571_v37 = vmul.f32 1.442695, %v1557_v26  ;;  %v1942_v10 = vsel %vm1618_vm4, %v1156_v13, 0 }
 0x5a5   :  { %v1581_v50 = vsel %vm1526_vm3, %v2915_v49, 0.0  ;;  %v1609_v55 = vpack.c.bf16 %v2915_v49, %v2915_v49 }
 0x5a6   :  { %v2917_v59 = vpop.eup %2916  ;;  %2924 = vpow2.f32 %v1571_v37  ;;  %1582 = vadd.xlane.f32.xlu0 %v1581_v50 }
 0x5a7   :  { %2797 = vmatmul.mubr.msk.bf16.vlgmr.msra.gmra.mrb[24].mxu1 %vm1526_vm3, %v1609_v55  ;;  %v1584_v34 = vsel %vm1526_vm3, %v2917_v59, 0.0  ;;  %v1610_v47 = vpack.c.bf16 %v2917_v59, %v2917_v59 }
 0x5a8   :  { %v2919_v58 = vpop.eup %2918  ;;  %2807 = vmatpush3.bf16.msra.mxu1 %v1804_v63  ;;  %1585 = vadd.xlane.f32.xlu1 %v1584_v34 }
 0x5a9   :  { %2803 = vmatmul.mubr.msk.bf16.vlgmr.msra.gmra.mrb[20].mxu0 %vm1526_vm3, %v1610_v47  ;;  %v1587_v6 = vsel %vm1526_vm3, %v2919_v58, 0.0  ;;  %2808 = vmatprep.mubr.msk.bf16.mxu1 %vm3277_vm1, %v3276_v3  ;;  %v1611_v9 = vpack.c.bf16 %v2919_v58, %v2919_v58 }
 0x5aa   :  { %2813 = vmatpush3.bf16.msra.mxu0 %v1850_v4  ;;  %1588 = vadd.xlane.f32.xlu0 %v1587_v6 }
 0x5ab   :  { %2818 = vmatprep.subr.bf16.mxu1 %v3276_v3  ;;  %2814 = vmatprep.mubr.msk.bf16.mxu0 %vm3277_vm1, %v3276_v3 }
 0x5ac   :  { %v2921_v60 = vpop.eup %2920  ;;  %2824 = vmatprep.subr.bf16.mxu0 %v3276_v3 }
 0x5ad   :  { %v1590_v12 = vsel %vm1526_vm3, %v2921_v60, 0.0  ;;  %v2923_v53 = vpop.eup %2922  ;;  %v1612_v5 = vpack.c.bf16 %v2921_v60, %v2921_v60 }
 0x5ae   :  { %1591 = vadd.xlane.f32.xlu1 %v1590_v12  ;;  %v1596_v51 = vsel %vm1526_vm3, %v2923_v53, 0.0  ;;  %v1614_v0 = vpack.c.bf16 %v2923_v53, %v2923_v53 }
 0x5af   :  { %2809 = vmatmul.mubr.msk.bf16.vlgmr.msra.gmra.mrb[28].mxu1 %vm1526_vm3, %v1611_v9 }
 0x5b0   :  { %v2925_v41 = vpop.eup %2924  ;;  %2819 = vmatpush3.bf16.msra.mxu1 %v1896_v61  ;;  %2820 = vmatprep.mubr.msk.bf16.mxu1 %vm3277_vm1, %v3276_v3 }
 0x5b1   :  { %2815 = vmatmul.mubr.msk.bf16.vlgmr.msra.gmra.mrb[24].mxu0 %vm1526_vm3, %v1612_v5  ;;  %v1593_v1 = vsel %vm1526_vm3, %v2925_v41, 0.0  ;;  %2830 = vmatprep.subr.bf16.mxu1 %v3276_v3  ;;  %v1613_v15 = vpack.c.bf16 %v2925_v41, %v2925_v41 }
 0x5b2   :  { %2825 = vmatpush3.bf16.msra.mxu0 %v1942_v10  ;;  %1597 = vadd.xlane.f32.xlu1 %v1596_v51 }
 0x5b3   :  { %1594 = vadd.xlane.f32.xlu0 %v1593_v1  ;;  %2826 = vmatprep.mubr.msk.bf16.mxu0 %vm3277_vm1, %v3276_v3 }
 0x5b4   :  { %2842 = vmatprep.subr.bf16.mxu0 %v3276_v3 }
 0x5b7   :  { %2821 = vmatmul.mubr.msk.bf16.vlgmr.msra.gmra.mrb[32].mxu1 %vm1526_vm3, %v1613_v15 }
 0x5b8   :  { %2838 = vmatprep.mubr.msk.bf16.mxu1 %vm3277_vm1, %v3276_v3  ;;  %2831 = vmatpush3.bf16.msra.mxu1 %v2896_v8 }
 0x5b9   :  { %2827 = vmatmul.mubr.msk.bf16.vlgmr.msra.gmra.mrb[28].mxu0 %vm1526_vm3, %v1614_v0  ;;  %2832 = vmatprep.subr.bf16.mxu1 %v3276_v3 }
 0x5ba   :  { %2846 = vmatprep.mubr.msk.bf16.mxu0 %vm3277_vm1, %v3276_v3 }
 0x5bc   :  { %2833 = vmatpush3.bf16.msra.mxu1 %v2897_v11 }
 0x5bd   :  { %2834 = vmatprep.subr.bf16.mxu1 %v3276_v3 }
 0x5c0   :  { %2835 = vmatpush3.bf16.msra.mxu1 %v2898_v16 }
 0x5c1   :  { %2836 = vmatprep.subr.bf16.mxu1 %v3276_v3 }
 0x5fc   :  { %v1577_v28 = vpop.xlane.xlu0 %1576 }
 0x5fd   :  { %2926 = vrcp.f32 %v1577_v28 }
 0x5fe   :  { %v1580_v30 = vpop.xlane.xlu1 %1579 }
 0x5ff   :  { %2928 = vrcp.f32 %v1580_v30 }
 0x607   :  { %v2927_v33 = vpop.eup %2926 }
 0x609   :  { %v2929_v19 = vpop.eup %2928 }
 0x633   :  { %v1583_v31 = vpop.xlane.xlu0 %1582 }
 0x634   :  { %2930 = vrcp.f32 %v1583_v31 }
 0x635   :  { %v1586_v32 = vpop.xlane.xlu1 %1585 }
 0x636   :  { %2932 = vrcp.f32 %v1586_v32 }
 0x637   :  { %v1589_v35 = vpop.xlane.xlu0 %1588 }
 0x638   :  { %2934 = vrcp.f32 %v1589_v35 }
 0x63b   :  { %v1592_v38 = vpop.xlane.xlu1 %1591 }
 0x63c   :  { %2936 = vrcp.f32 %v1592_v38 }
 0x63e   :  { %v2931_v40 = vpop.eup %2930 }
 0x63f   :  { %v1598_v59 = vpop.xlane.xlu1 %1597 }
 0x640   :  { %v1595_v42 = vpop.xlane.xlu0 %1594  ;;  %v2933_v26 = vpop.eup %2932 }
 0x641   :  { %2938 = vrcp.f32 %v1595_v42 }
 0x642   :  { %2940 = vrcp.f32 %v1598_v59  ;;  %v2935_v51 = vpop.eup %2934 }
 0x652   :  { %v1656_v17 = vpop.f32.mrb[20].mxu1 }
 0x653   :  { %v2786_v14 = vpop.f32.mrb[21].mxu1  ;;  %v1984_v36 = vmul.f32 %v2927_v33, %v1656_v17 }
 0x654   :  { %v1659_v20 = vpop.f32.mrb[22].mxu1  ;;  %v1702_v22 = vpop.f32.mrb[16].mxu0 }
 0x655   :  { %v2787_v23 = vpop.f32.mrb[23].mxu1  ;;  %v2792_v24 = vpop.f32.mrb[17].mxu0  ;;  %v1985_v39 = vmul.f32 %v2929_v19, %v1702_v22  ;;  %v1992_v43 = vpack.c.bf16 %v1984_v36, %v1984_v36 }
 0x656   :  { %v1705_v25 = vpop.f32.mrb[18].mxu0  ;;  %v2937_v20 = vpop.eup %2936 }
 0x657   :  { %v2793_v27 = vpop.f32.mrb[19].mxu0  ;;  %v2026_v49 = vpack.c.bf16 %v1985_v39, %v1985_v39  ;;  %v1999_v63 = vrot.slane %v1992_v43, %v3531_v56  ;;  %v2939_v32 = vpop.eup %2938 }
 0x659   :  { %v2033_v58 = vrot.slane %v2026_v49, %v3531_v56 }
 0x67a   :  { %v1748_v21 = vpop.f32.mrb[24].mxu1 }
 0x67b   :  { %v1986_v44 = vmul.f32 %v2931_v40, %v1748_v21  ;;  %v2798_v45 = vpop.f32.mrb[25].mxu1 }
 0x67c   :  { %v1751_v46 = vpop.f32.mrb[26].mxu1  ;;  %v1794_v48 = vpop.f32.mrb[20].mxu0 }
 0x67d   :  { %v2000_v37 = vpack.c.bf16 %v1986_v44, %v1986_v44  ;;  %v1987_v50 = vmul.f32 %v2933_v26, %v1794_v48  ;;  %v2799_v55 = vpop.f32.mrb[27].mxu1  ;;  %v2804_v57 = vpop.f32.mrb[21].mxu0 }
 0x67e   :  { %v1797_v29 = vpop.f32.mrb[22].mxu0  ;;  %v2941_v44 = vpop.eup %2940 }
 0x67f   :  { %v2007_v34 = vrot.slane %v2000_v37, %v3531_v56  ;;  %v2034_v47 = vpack.c.bf16 %v1987_v50, %v1987_v50  ;;  %v2805_v54 = vpop.f32.mrb[23].mxu0 }
 0x681   :  { %v2008_v4 = vcombine.low %v1999_v63, %v2007_v34  ;;  %v2009_v6 = vcombine.high %v1999_v63, %v2007_v34  ;;  %v2041_v7 = vrot.slane %v2034_v47, %v3531_v56 }
 0x682   :  { %v1840_v52 = vpop.f32.mrb[28].mxu1 }
 0x683   :  { %v2016_v2 = vrot.slane %v2008_v4, %v3535_v62  ;;  %v2023_v60 = vrot.slane %v2009_v6, %v3535_v62  ;;  %v2042_v12 = vcombine.low %v2033_v58, %v2041_v7  ;;  %v2043_v9 = vcombine.high %v2033_v58, %v2041_v7  ;;  %v2810_v13 = vpop.f32.mrb[29].mxu1 }
 0x684   :  { %v1843_v53 = vpop.f32.mrb[30].mxu1  ;;  %v1886_v61 = vpop.f32.mrb[24].mxu0  ;;  %v1988_v17 = vmul.f32 %v2935_v51, %v1840_v52 }
 0x685   :  { %v2024_v5 = vcombine.high %v2016_v2, %v3270_v18  ;;  %v2811_v41 = vpop.f32.mrb[31].mxu1  ;;  %v2816_v10 = vpop.f32.mrb[25].mxu0  ;;  %v2050_v1 = vrot.slane %v2042_v12, %v3535_v62  ;;  %v2057_v15 = vrot.slane %v2043_v9, %v3535_v62  ;;  %v2025_v8 = vcombine.high %v2023_v60, %v3270_v18 }
 0x686   :  { %v1889_v0 = vpop.f32.mrb[26].mxu0  ;;  %v2132_v11 = vshrl.u32 %v2016_v2, 16  ;;  %v2148_v16 = vshrl.u32 %v2023_v60, 16  ;;  %v1989_v31 = vmul.f32 %v2937_v20, %v1886_v61  ;;  %v2060_v26 = vpack.c.bf16 %v1988_v17, %v1988_v17 }
 0x687   :  { %v2817_v14 = vpop.f32.mrb[27].mxu0  ;;  %v2058_v22 = vcombine.high %v2050_v1, %v3270_v18  ;;  %v2059_v23 = vcombine.high %v2057_v15, %v3270_v18  ;;  %v2130_v24 = vpack.i.b16 %v2050_v1, %v2016_v2  ;;  %v2133_v25 = vshrl.u32 %v2050_v1, 16 }
 0x688   :  { %v2140_v27 = vshrl.u32 %v2024_v5, 16  ;;  %v2146_v28 = vpack.i.b16 %v2057_v15, %v2023_v60  ;;  %v2149_v30 = vshrl.u32 %v2057_v15, 16  ;;  %v2156_v39 = vshrl.u32 %v2025_v8, 16 }
 0x689   :  { %v2134_v33 = vpack.i.b16 %v2133_v25, %v2132_v11  ;;  %v2138_v35 = vpack.i.b16 %v2058_v22, %v2024_v5  ;;  %v2141_v36 = vshrl.u32 %v2058_v22, 16  ;;  %v2154_v19 = vpack.i.b16 %v2059_v23, %v2025_v8 }
 0x68a   :  { %v1932_v38 = vpop.f32.mrb[32].mxu1  ;;  %v2150_v40 = vpack.i.b16 %v2149_v30, %v2148_v16  ;;  %v2157_v21 = vshrl.u32 %v2059_v23, 16  ;;  %v2192_v42 = vcombine.low %v2130_v24, %v2146_v28  ;;  %v2094_v55 = vpack.c.bf16 %v1989_v31, %v1989_v31 }
 0x68b   :  { %v2822_v43 = vpop.f32.mrb[33].mxu1  ;;  %v2142_v45 = vpack.i.b16 %v2141_v36, %v2140_v27  ;;  %v1990_v46 = vmul.f32 %v2939_v32, %v1932_v38  ;;  %v2200_v37 = vcombine.low %v2138_v35, %v2154_v19  ;;  %v2067_v52 = vrot.slane %v2060_v26, %v3531_v56  ;;  %v2899_v26 = vld [vmem:[#allocation10 + $0x18] sm:$0xff]  }
 0x68c   :  { %v1935_v48 = vpop.f32.mrb[34].mxu1  ;;  %v1978_v49 = vpop.f32.mrb[28].mxu0  ;;  %v2158_v50 = vpack.i.b16 %v2157_v21, %v2156_v39  ;;  %v2242_v63 = vcombine.low %v2134_v33, %v2150_v40  ;;  %v2199_v54 = vrot.slane %v2192_v42, %v3531_v56  ;;  %v2101_v12 = vrot.slane %v2094_v55, %v3531_v56  ;;  %2837 = vmatpush3.bf16.msra.mxu1 %v2899_v26  ;;  %v2678_v26 = vld [vmem:[#allocation14] ss:$0 sm:$0xff] }
 0x68d   :  { %v1991_v57 = vmul.f32 %v2941_v44, %v1978_v49  ;;  %v2823_v29 = vpop.f32.mrb[35].mxu1  ;;  %v2828_v59 = vpop.f32.mrb[29].mxu0  ;;  %v2068_v34 = vpack.c.bf16 %v1990_v46, %v1990_v46  ;;  %v2207_v58 = vrot.slane %v2200_v37, %v3531_v56 }
 0x68e   :  { %v1981_v47 = vpop.f32.mrb[30].mxu0  ;;  %v2250_v7 = vcombine.low %v2142_v45, %v2158_v50  ;;  %v2249_v13 = vrot.slane %v2242_v63, %v3531_v56 }
 0x68f   :  { %v2102_v4 = vpack.c.bf16 %v1991_v57, %v1991_v57  ;;  %v2829_v6 = vpop.f32.mrb[31].mxu0  ;;  %v2075_v2 = vrot.slane %v2068_v34, %v3531_v56  ;;  %v2224_v60 = vcombine.low %v2199_v54, %v2207_v58 }
 0x690   :  { %v2257_v53 = vrot.slane %v2250_v7, %v3531_v56 }
 0x691   :  { %v2109_v9 = vrot.slane %v2102_v4, %v3531_v56  ;;  %v2076_v61 = vcombine.low %v2067_v52, %v2075_v2  ;;  %v2077_v5 = vcombine.high %v2067_v52, %v2075_v2  ;;  %v2231_v49 = vrot.slane %v2224_v60, %v3535_v62 }
 0x692   :  { %v2274_v51 = vcombine.low %v2249_v13, %v2257_v53  ;;  %v2671_v53 = vld [vmem:[#allocation11] ss:$0 sm:$0xff] }
 0x693   :  { %v2110_v41 = vcombine.low %v2101_v12, %v2109_v9  ;;  %v2111_v10 = vcombine.high %v2101_v12, %v2109_v9  ;;  %v2084_v1 = vrot.slane %v2076_v61, %v3535_v62  ;;  %v2091_v15 = vrot.slane %v2077_v5, %v3535_v62 }
 0x694   :  { %v2281_v29 = vrot.slane %v2274_v51, %v3535_v62  ;;  %v2950_v51 = vld [vmem:[#allocation2] sm:$0xff] }
 0x695   :  { %v2118_v0 = vrot.slane %v2110_v41, %v3535_v62  ;;  %v2125_v8 = vrot.slane %v2111_v10, %v3535_v62  ;;  %v2092_v11 = vcombine.high %v2084_v1, %v3270_v18  ;;  %v2093_v16 = vcombine.high %v2091_v15, %v3270_v18 }
 0x696   :  { %v2164_v17 = vshrl.u32 %v2084_v1, 16  ;;  %v2180_v25 = vshrl.u32 %v2091_v15, 16 }
 0x697   :  { %v2126_v14 = vcombine.high %v2118_v0, %v3270_v18  ;;  %v2127_v20 = vcombine.high %v2125_v8, %v3270_v18  ;;  %v2162_v22 = vpack.i.b16 %v2118_v0, %v2084_v1  ;;  %v2165_v23 = vshrl.u32 %v2118_v0, 16 }
 0x698   :  { %v2172_v24 = vshrl.u32 %v2092_v11, 16  ;;  %v2178_v27 = vpack.i.b16 %v2125_v8, %v2091_v15  ;;  %v2181_v28 = vshrl.u32 %v2125_v8, 16  ;;  %v2188_v35 = vshrl.u32 %v2093_v16, 16  ;;  %v2951_v8 = vld [vmem:[#allocation2 + $0x8] sm:$0xff] }
 0x699   :  { %v2166_v30 = vpack.i.b16 %v2165_v23, %v2164_v17  ;;  %v2170_v31 = vpack.i.b16 %v2126_v14, %v2092_v11  ;;  %v2173_v32 = vshrl.u32 %v2126_v14, 16  ;;  %v2186_v33 = vpack.i.b16 %v2127_v20, %v2093_v16 }
 0x69a   :  { %v2182_v36 = vpack.i.b16 %v2181_v28, %v2180_v25  ;;  %v2189_v19 = vshrl.u32 %v2127_v20, 16  ;;  %v2208_v38 = vcombine.low %v2162_v22, %v2178_v27 }
 0x69b   :  { %v2174_v39 = vpack.i.b16 %v2173_v32, %v2172_v24  ;;  %v2216_v40 = vcombine.low %v2170_v31, %v2186_v33  ;;  %v2900_v32 = vld [vmem:[#allocation16] sm:$0xff]   ;;  %v2901_v33 = vld [vmem:[#allocation16 + $0x8] sm:$0xff]  }
 0x69c   :  { %v2190_v21 = vpack.i.b16 %v2189_v19, %v2188_v35  ;;  %v2258_v42 = vcombine.low %v2166_v30, %v2182_v36  ;;  %v2215_v18 = vrot.slane %v2208_v38, %v3531_v56  ;;  %2843 = vmatpush3.bf16.msra.mxu0 %v2900_v32 }
 0x69d   :  { %v2223_v43 = vrot.slane %v2216_v40, %v3531_v56  ;;  %2844 = vmatprep.subr.bf16.mxu0 %v3276_v3 }
 0x69e   :  { %v2266_v44 = vcombine.low %v2174_v39, %v2190_v21  ;;  %v2265_v46 = vrot.slane %v2258_v42, %v3531_v56 }
 0x69f   :  { %v2232_v45 = vcombine.low %v2215_v18, %v2223_v43  ;;  %v2677_v18 = vld [vmem:[#allocation13] ss:$0 sm:$0xff] }
 0x6a0   :  { %v2273_v48 = vrot.slane %v2266_v44, %v3531_v56  ;;  %2845 = vmatpush3.bf16.msra.mxu0 %v2901_v33 }
 0x6a1   :  { %v2239_v37 = vrot.slane %v2232_v45, %v3535_v62  ;;  %2850 = vmatprep.subr.bf16.mxu0 %v3276_v3 }
 0x6a2   :  { %v2282_v50 = vcombine.low %v2265_v46, %v2273_v48 }
 0x6a3   :  { %v2241_v55 = vcombine.high %v2231_v49, %v2239_v37  ;;  %v2240_v57 = vcombine.low %v2231_v49, %v2239_v37 }
 0x6a4   :  { %v2289_v59 = vrot.slane %v2282_v50, %v3535_v62  ;;  %v2902_v50 = vld [vmem:[#allocation19] sm:$0xff]  }
 0x6a5   :  { %v2295_v47 = vshrl.u32 %v2240_v57, 16  ;;  %v2301_v54 = vshrl.u32 %v2241_v55, 16 }
 0x6a6   :  { %v2291_v63 = vcombine.high %v2281_v29, %v2289_v59  ;;  %v2290_v34 = vcombine.low %v2281_v29, %v2289_v59  ;;  %v2905_v29 = vld [vmem:[#allocation19 + $0x18] sm:$0xff]  }
 0x6a7   :  { %v2679_v59 = vld [vmem:[#allocation17] ss:$0 sm:$0xff] }
 0x6a8   :  { %v2300_v58 = vpack.i.b16 %v2291_v63, %v2241_v55  ;;  %v2296_v4 = vshrl.u32 %v2290_v34, 16  ;;  %v2302_v6 = vshrl.u32 %v2291_v63, 16  ;;  %v2294_v56 = vpack.i.b16 %v2290_v34, %v2240_v57  ;;  %v2903_v55 = vld [vmem:[#allocation19 + $0x8] sm:$0xff]   ;;  %v2904_v57 = vld [vmem:[#allocation19 + $0x10] sm:$0xff]  }
 0x6aa   :  { %2306 = vrot.lane.b32.xlu1 %v2300_v58, %s3278_s2  ;;  %v2297_v7 = vpack.i.b16 %v2296_v4, %v2295_v47  ;;  %v2303_v52 = vpack.i.b16 %v2302_v6, %v2301_v54 }
 0x6ac   :  { %2304 = vrot.lane.b32.xlu0 %v2297_v7, %s3279_s26 }
 0x6ae   :  { %2308 = vrot.lane.b32.xlu1 %v2303_v52, %s3280_s14 }
 0x71c   :  { %v2307_v2 = vpop.permute.xlu1 %2306 }
 0x71e   :  { %v2305_v60 = vpop.permute.xlu0 %2304 }
 0x71f   :  { %v2312_v62 = vsel %vm1157_vm2, %v2294_v56, %v2305_v60 }
 0x720   :  { %v2309_v12 = vpop.permute.xlu1 %2308  ;;  %v2314_v9 = vsel %vm196_vm0, %v2312_v62, %v2307_v2 }
 0x721   :  { %v2317_v13 = vsel %vm2315_vm5, %v2314_v9, %v2309_v12 }
 0x722   :  { %2839 = vmatmul.mubr.msk.bf16.vlgmr.msra.gmra.mrb[36].mxu1 %vm2357_vm6, %v2317_v13 }
 0x7f5   :  { %v2394_v61 = vpop.f32.mrb[36].mxu1 }
 0x7f6   :  { %v2395_v5 = vadd.f32 %v2671_v53, %v2394_v61  ;;  %v2840_v41 = vpop.f32.mrb[37].mxu1 }
 0x7f7   :  { %v2397_v10 = vpop.f32.mrb[38].mxu1 }
 0x7f8   :  { %v3896_v1 = vadd.f32 %v2950_v51, %v2395_v5  ;;  %v2398_v15 = vadd.f32 %v2671_v53, %v2397_v10  ;;  %v2841_v0 = vpop.f32.mrb[39].mxu1  ;;  %v2683_v53 = vld [vmem:[#allocation20] ss:$0 sm:$0xff] }
 0x7fa   :  { %v3898_v11 = vadd.f32 %v2951_v8, %v2398_v15  ;;  %v2405_v16 = vsel %vm196_vm0, %v3896_v1, 0.0 }
 0x7fb   :  { %2406 = vadd.xlane.f32.xlu1 %v2405_v16 }
 0x7fc   :  { %v2408_v17 = vsel %vm196_vm0, %v3898_v11, 0.0 }
 0x7fd   :  { %2409 = vadd.xlane.f32.xlu0 %v2408_v17 }
 0x888   :  { %v2407_v14 = vpop.xlane.xlu1 %2406 }
 0x889   :  { %v2411_v20 = vmul.f32 0.03125, %v2407_v14 }
 0x88a   :  { %v2410_v22 = vpop.xlane.xlu0 %2409 }
 0x88b   :  { %v2413_v23 = vsub.f32 %v3896_v1, %v2411_v20  ;;  %v2412_v24 = vmul.f32 0.03125, %v2410_v22 }
 0x88d   :  { %v2414_v25 = vsub.f32 %v3898_v11, %v2412_v24  ;;  %v2415_v27 = vmul.f32 %v2413_v23, %v2413_v23 }
 0x88f   :  { %v2417_v28 = vsel %vm196_vm0, %v2415_v27, 0.0  ;;  %v2416_v30 = vmul.f32 %v2414_v25, %v2414_v25 }
 0x890   :  { %2418 = vadd.xlane.f32.xlu0 %v2417_v28 }
 0x891   :  { %v2420_v31 = vsel %vm196_vm0, %v2416_v30, 0.0 }
 0x894   :  { %2421 = vadd.xlane.f32.xlu0 %v2420_v31 }
 0x91d   :  { %v2419_v35 = vpop.xlane.xlu0 %2418 }
 0x91e   :  { %v2423_v36 = vmul.f32 0.03125, %v2419_v35 }
 0x920   :  { %v2425_v19 = vadd.f32 1e-05, %v2423_v36 }
 0x921   :  { %v2422_v38 = vpop.xlane.xlu0 %2421 }
 0x922   :  { %2942 = vrsqrt.f32 %v2425_v19  ;;  %v2424_v39 = vmul.f32 0.03125, %v2422_v38 }
 0x924   :  { %v2426_v40 = vadd.f32 1e-05, %v2424_v39 }
 0x926   :  { %2944 = vrsqrt.f32 %v2426_v40 }
 0x92c   :  { %v2943_v21 = vpop.eup %2942 }
 0x92d   :  { %v2429_v42 = vmul.f32 %v2943_v21, %v2413_v23 }
 0x92f   :  { %v2437_v44 = vmul.f32 %v2677_v18, %v2429_v42 }
 0x930   :  { %v2945_v43 = vpop.eup %2944 }
 0x931   :  { %v2430_v45 = vmul.f32 %v2945_v43, %v2414_v25  ;;  %v2445_v48 = vadd.f32 %v2678_v26, %v2437_v44 }
 0x933   :  { %v2438_v46 = vmul.f32 %v2677_v18, %v2430_v45 }
 0x935   :  { %v2446_v49 = vadd.f32 %v2678_v26, %v2438_v46 }
 0x937   :  { %v2447_v37 = vpack.c.bf16 %v2446_v49, %v2445_v48 }
 0x939   :  { %2847 = vmatmul.mubr.msk.bf16.vlgmr.msra.gmra.mrb[32].mxu0 %vm196_vm0, %v2447_v37 }
 0x93a   :  { %2858 = vmatprep.mubr.msk.bf16.mxu0 %vm3277_vm1, %v3276_v3  ;;  %2851 = vmatpush3.bf16.msra.mxu0 %v2902_v50 }
 0x93b   :  { %2852 = vmatprep.subr.bf16.mxu0 %v3276_v3 }
 0x93e   :  { %2853 = vmatpush3.bf16.msra.mxu0 %v2903_v55 }
 0x93f   :  { %2854 = vmatprep.subr.bf16.mxu0 %v3276_v3 }
 0x942   :  { %2855 = vmatpush3.bf16.msra.mxu0 %v2904_v57 }
 0x943   :  { %2856 = vmatprep.subr.bf16.mxu0 %v3276_v3 }
 0x946   :  { %2857 = vmatpush3.bf16.msra.mxu0 %v2905_v29 }
 0xa0c   :  { %v2508_v63 = vpop.f32.mrb[32].mxu0 }
 0xa0d   :  { %v2509_v34 = vadd.f32 %v2679_v59, %v2508_v63  ;;  %v2848_v47 = vpop.f32.mrb[33].mxu0 }
 0xa0e   :  { %v2511_v54 = vpop.f32.mrb[34].mxu0 }
 0xa0f   :  { %v2517_v58 = vmul.f32 0.70710677, %v2509_v34  ;;  %v2512_v4 = vadd.f32 %v2679_v59, %v2511_v54  ;;  %v2849_v6 = vpop.f32.mrb[35].mxu0  ;;  %v2515_v60 = vmul.f32 0.5, %v2509_v34 }
 0xa11   :  { %2946 = verf.f32 %v2517_v58  ;;  %v2518_v56 = vmul.f32 0.70710677, %v2512_v4  ;;  %v2516_v62 = vmul.f32 0.5, %v2512_v4 }
 0xa13   :  { %2948 = verf.f32 %v2518_v56 }
 0xa1b   :  { %v2947_v7 = vpop.eup %2946 }
 0xa1c   :  { %v2521_v52 = vadd.f32 1.0, %v2947_v7 }
 0xa1d   :  { %v2949_v2 = vpop.eup %2948 }
 0xa1e   :  { %v2522_v12 = vadd.f32 1.0, %v2949_v2  ;;  %v2523_v9 = vmul.f32 %v2521_v52, %v2515_v60 }
 0xa20   :  { %v2524_v3 = vmul.f32 %v2522_v12, %v2516_v62 }
 0xa22   :  { %v2525_v13 = vpack.c.bf16 %v2524_v3, %v2523_v9 }
 0xa24   :  { %2859 = vmatmul.mubr.msk.bf16.vlgmr.msra.gmra.mrb[36].mxu0 %vm2357_vm6, %v2525_v13 }
 0xaf7   :  { %v2602_v61 = vpop.f32.mrb[36].mxu0 }
 0xaf8   :  { %v2603_v5 = vadd.f32 %v2683_v53, %v2602_v61  ;;  %v2860_v41 = vpop.f32.mrb[37].mxu0 }
 0xaf9   :  { %v2605_v10 = vpop.f32.mrb[38].mxu0 }
 0xafa   :  { %v2609_v51 = vadd.f32 %v2603_v5, %v3896_v1  ;;  %v2606_v15 = vadd.f32 %v2683_v53, %v2605_v10  ;;  %v2861_v0 = vpop.f32.mrb[39].mxu0 }
 0xafc   :  { %2611 = vst.msk [vmem:[#allocation22] sm:$0xff] %vm196_vm0, %v2609_v51  ;;  %v2610_v8 = vadd.f32 %v2606_v15, %v3898_v11 }
 0xafe   :  { %2612 = vst.msk [vmem:[#allocation22 + $0x8] sm:$0xff] %vm196_vm0, %v2610_v8 }
 0xaff   :  { %3227 = shalt.err (!%p3224_p2)
}
 0xb00   :  { %s3228_s4 = scalar_lea.hbm %s3948_s12, 256 }
 0xb01   :  { %p3229_p3 = scmp.ne.s32.totalorder %s3948_s12, %s3228_s4  ;;  %p3232_p4 = scmp.lt.u32.totalorder %s3228_s4, %s3948_s12 }
 0xb03   :  { %p3234_p5 = pnand %p3232_p4, %p3229_p3 }
 0xb05   :  { %3237 = shalt.err (!%p3234_p5)
}
 0xb06   :  { %2624 = dma.vmem_to_hbm [thread:$0]  %s2619_s0, 256, %s3948_s12, [#allocation4], %s3257_s22, %s3257_s22, %s3258_s28  }
 0xb07   :  { %3252 = dma.done.wait [#allocation4], 256  }
 0xb08   :  { %3253 = vsyncadd [#allocation4], 4294967040 }
 0xb09   :  { %2628 = vsyncpa [#allocation3], 1 }
 0xb0a   :  { %2629 = vsyncpa [#allocation6], 1 }
 0xb0b   :  { %2630 = vsyncpa [#allocation9], 1 }
 0xb0c   :  { %2631 = vsyncpa [#allocation12], 1 }
 0xb0d   :  { %2632 = vsyncpa [#allocation15], 1 }
 0xb0e   :  { %2633 = vsyncpa [#allocation18], 1 }
 0xb0f   :  { %2634 = vsyncpa [#allocation21], 1 }
 0xb10   :  { %2635 = vsyncpa [#allocation4], 1 }

</bundles_post_ra>
